<compile_context>
chip_gen: v7x
topology: tpu7x:2x2x1
jax: 0.10.0
libtpu: 0.0.40
codegen_flags: <defaults>
</compile_context>

<pallas_src>
import jax
import jax.numpy as jnp
from jax.experimental import pallas as pl
from jax.experimental.pallas import tpu as pltpu

BN_EPS = 1e-5
SUBLANE = 8  # f32 sublane tile


def _round_up(n, m):
    return ((n + m - 1) // m) * m


def _pad_axis(a, axis, size):
    """Zero-pad `a` along `axis` up to `size` (no-op if already that size)."""
    if a.shape[axis] == size:
        return a
    widths = [(0, 0)] * a.ndim
    widths[axis] = (0, size - a.shape[axis])
    return jnp.pad(a, widths)


def _vmem_limit_bytes():
    # Generation-aware scoped-VMEM budget: ~3/4 of physical VMEM
    # (~96 MiB on v5e/v6e's 128 MiB, ~48 MiB on v7x's 64 MiB).
    try:
        return int(pltpu.get_tpu_info().vmem_capacity_bytes * 3 // 4)
    except Exception:
        return 32 * 1024 * 1024


# ---------------------------------------------------------------------------
# Pallas kernel: fused (optional prev-BN affine + ReLU) -> depthwise 3x3 ->
# pointwise 1x1 (bf16 MXU, f32 acc) -> +folded bias -> bf16 write + BN partial
# sums.  Handles a static number of input channel slabs (block1 gets x2 and the
# upsampled x1 separately, fusing torch.cat).
# ---------------------------------------------------------------------------
def _make_dsconv_kernel(width, num_slabs, has_affine, apply_relu):
    def kernel(*refs):
        it = iter(refs)
        x_refs = [next(it) for _ in range(num_slabs)]
        aff_refs = [next(it) for _ in range(num_slabs)] if has_affine else None
        wdw_refs = [next(it) for _ in range(num_slabs)]
        mask_ref = next(it)
        wpwt_refs = [next(it) for _ in range(num_slabs)]
        bias_ref = next(it)
        y_ref = next(it)
        stats_ref = next(it)

        mask = mask_ref[...]                            # (9, P) border masks
        y = None
        for s in range(num_slabs):
            # (C_s, P); upcast to f32 immediately (v5e has no bf16 VPU)
            x = x_refs[s][0].astype(jnp.float32)
            if has_affine:
                aff = aff_refs[s]
                x = x * aff[:, 0:1] + aff[:, 1:2]       # fused previous BN
            if apply_relu:
                x = jnp.maximum(x, 0.0)

            wdw = wdw_refs[s][...]                      # (C_s, 9)
            p = x.shape[1]
            # center tap: no roll, its border mask is all ones
            acc = x * wdw[:, 4:5]
            for dy in (-1, 0, 1):
                for dx in (-1, 0, 1):
                    if dy == 0 and dx == 0:
                        continue
                    tap = (dy + 1) * 3 + (dx + 1)
                    shift = (-(dy * width + dx)) % p
                    xs = pltpu.roll(x, shift, axis=1)   # XLU lane rotation
                    acc = acc + (xs * mask[tap:tap + 1, :]) * wdw[:, tap:tap + 1]

            # pointwise 1x1 conv on the MXU (bf16 operands, f32 accumulation)
            part = jnp.dot(wpwt_refs[s][...], acc.astype(jnp.bfloat16),
                           preferred_element_type=jnp.float32)  # (Cout_pad, P)
            y = part if y is None else y + part

        y = y + bias_ref[...]
        y_ref[0] = y.astype(y_ref.dtype)
        # one-pass BatchNorm partial statistics (f32), per image / grid step
        stats_ref[0, :, 0:1] = jnp.sum(y, axis=1, keepdims=True)
        stats_ref[0, :, 1:2] = jnp.sum(y * y, axis=1, keepdims=True)

    return kernel


def _dsconv_pass(x_slabs, affs, wdws, mask, wpwts, bias, *,
                 width, apply_relu, out_dtype):
    num_slabs = len(x_slabs)
    has_affine = affs is not None
    n, _, pix = x_slabs[0].shape
    cout_pad = bias.shape[0]

    args, in_specs = [], []
    for xs in x_slabs:
        args.append(xs)
        in_specs.append(pl.BlockSpec((1, xs.shape[1], pix), lambda i: (i, 0, 0)))
    if has_affine:
        for a in affs:
            args.append(a)
            in_specs.append(pl.BlockSpec(a.shape, lambda i: (0, 0)))
    for wdw in wdws:
        args.append(wdw)
        in_specs.append(pl.BlockSpec(wdw.shape, lambda i: (0, 0)))
    args.append(mask)
    in_specs.append(pl.BlockSpec(mask.shape, lambda i: (0, 0)))
    for wt in wpwts:
        args.append(wt)
        in_specs.append(pl.BlockSpec(wt.shape, lambda i: (0, 0)))
    args.append(bias)
    in_specs.append(pl.BlockSpec(bias.shape, lambda i: (0, 0)))

    kernel = _make_dsconv_kernel(width, num_slabs, has_affine, apply_relu)
    return pl.pallas_call(
        kernel,
        out_shape=[jax.ShapeDtypeStruct((n, cout_pad, pix), out_dtype),
                   jax.ShapeDtypeStruct((n, cout_pad, 2), jnp.float32)],
        grid_spec=pltpu.PrefetchScalarGridSpec(
            num_scalar_prefetch=0,
            grid=(n,),
            in_specs=in_specs,
            out_specs=[
                pl.BlockSpec((1, cout_pad, pix), lambda i: (i, 0, 0)),
                pl.BlockSpec((1, cout_pad, 2), lambda i: (i, 0, 0)),
            ],
        ),
        compiler_params=pltpu.CompilerParams(
            dimension_semantics=("parallel",),
            vmem_limit_bytes=_vmem_limit_bytes(),
        ),
    )(*args)


# ---------------------------------------------------------------------------
# Host-side helpers
# ---------------------------------------------------------------------------
def _tap_masks(h, w):
    """Per-tap lane masks implementing the conv's zero padding on H/W borders."""
    pos = jnp.arange(h * w, dtype=jnp.int32)
    hh = pos // w
    ww = pos % w
    masks = []
    for dy in (-1, 0, 1):
        for dx in (-1, 0, 1):
            ok = ((hh + dy >= 0) & (hh + dy < h) & (ww + dx >= 0) & (ww + dx < w))
            masks.append(ok.astype(jnp.float32))
    return jnp.stack(masks, axis=0)               # (9, h*w)


def _bn_scale_shift(stats, gamma, beta, count):
    """Reduce per-image partial sums -> training-mode BN affine (scale, shift)."""
    s1 = jnp.sum(stats[:, :, 0], axis=0)
    s2 = jnp.sum(stats[:, :, 1], axis=0)
    mean = s1 / count
    var = jnp.maximum(s2 / count - mean * mean, 0.0)   # one-pass E[y^2]-E[y]^2
    scale = gamma * jax.lax.rsqrt(var + BN_EPS)
    shift = beta - mean * scale
    return jnp.stack([scale, shift], axis=1)           # (C_pad, 2)


def _bilinear_matrix(n_in, n_out):
    if n_in == 1:
        return jnp.ones((n_out, 1), jnp.float32)
    pos = jnp.arange(n_out, dtype=jnp.float32) * (n_in - 1) / (n_out - 1)
    lo = jnp.clip(jnp.floor(pos).astype(jnp.int32), 0, n_in - 2)
    frac = pos - lo.astype(jnp.float32)
    rows = jnp.arange(n_out)
    a = jnp.zeros((n_out, n_in), jnp.float32)
    a = a.at[rows, lo].add(1.0 - frac)
    a = a.at[rows, lo + 1].add(frac)
    return a


# ---------------------------------------------------------------------------
# Public forward: `Up.forward(x1, x2)` with NCHW in / NCHW out
# ---------------------------------------------------------------------------
def up_forward(x1_nchw, x2_nchw, params):
    f32, bf16 = jnp.float32, jnp.bfloat16
    x1 = x1_nchw.astype(f32)
    x2 = x2_nchw.astype(f32)
    n, c2, h, w = x2.shape
    c1, h1, w1 = x1.shape[1], x1.shape[2], x1.shape[3]

    # --- JAX glue: bilinear x2 upsample (align_corners=True) + F.pad ---
    ah = _bilinear_matrix(h1, 2 * h1)
    aw = _bilinear_matrix(w1, 2 * w1)
    x1u = jnp.einsum("Hh,nchw->ncHw", ah, x1)
    x1u = jnp.einsum("Ww,nchw->nchW", aw, x1u)
    diff_y = h - x1u.shape[2]
    diff_x = w - x1u.shape[3]
    x1u = jnp.pad(x1u, ((0, 0), (0, 0),
                        (diff_y // 2, diff_y - diff_y // 2),
                        (diff_x // 2, diff_x - diff_x // 2)))

    p1, p2 = params["block1"], params["block2"]
    cin = c2 + c1
    cout = p1["w_pw"].shape[1]
    c2_pad = _round_up(c2, SUBLANE)
    c1_pad = _round_up(c1, SUBLANE)
    cout_pad = _round_up(cout, SUBLANE)
    pix = h * w
    count = float(n * pix)

    # Lane-dense layout: channels (padded only to sublane tile 8) on sublanes,
    # flattened H*W on lanes.  x2 / x1u stay separate slabs -> torch.cat fused.
    x2_flat = _pad_axis(x2.reshape(n, c2, pix), 1, c2_pad)
    x1_flat = _pad_axis(x1u.reshape(n, c1, pix), 1, c1_pad)
    mask = _tap_masks(h, w)

    # -- block1 params, split along the concat boundary into the two slabs --
    wdw1 = p1["w_dw"].reshape(9, cin).T.astype(f32)         # (cin, 9)
    wdw1_s2 = _pad_axis(wdw1[:c2], 0, c2_pad)
    wdw1_s1 = _pad_axis(wdw1[c2:], 0, c1_pad)
    wpw1_t = p1["w_pw"].T.astype(f32)                       # (cout, cin)
    wpw1_s2 = _pad_axis(_pad_axis(wpw1_t[:, :c2], 1, c2_pad), 0, cout_pad).astype(bf16)
    wpw1_s1 = _pad_axis(_pad_axis(wpw1_t[:, c2:], 1, c1_pad), 0, cout_pad).astype(bf16)
    bias1 = _pad_axis((p1["b_pw"] + p1["b_dw"] @ p1["w_pw"]).astype(f32)[:, None],
                      0, cout_pad)
    gamma1 = _pad_axis(p1["gamma"].astype(f32), 0, cout_pad)
    beta1 = _pad_axis(p1["beta"].astype(f32), 0, cout_pad)

    # -- block2 params (input = y1 with cout_pad channels) --
    wdw2 = _pad_axis(p2["w_dw"].reshape(9, cout).T.astype(f32), 0, cout_pad)
    wpw2_t = _pad_axis(_pad_axis(p2["w_pw"].T.astype(f32), 1, cout_pad),
                       0, cout_pad).astype(bf16)
    bias2 = _pad_axis((p2["b_pw"] + p2["b_dw"] @ p2["w_pw"]).astype(f32)[:, None],
                      0, cout_pad)
    gamma2 = _pad_axis(p2["gamma"].astype(f32), 0, cout_pad)
    beta2 = _pad_axis(p2["beta"].astype(f32), 0, cout_pad)

    # block 1: depthwise + pointwise (+ BN partial stats); its BN+ReLU is fused
    # into block2's input stage, so y1 crosses HBM once, un-normalized, in bf16.
    y1, st1 = _dsconv_pass([x2_flat, x1_flat], None, [wdw1_s2, wdw1_s1], mask,
                           [wpw1_s2, wpw1_s1], bias1,
                           width=w, apply_relu=False, out_dtype=bf16)
    aff1 = _bn_scale_shift(st1, gamma1, beta1, count)

    # block 2: fused BN1 + ReLU on the input, then depthwise + pointwise (+ stats)
    y2, st2 = _dsconv_pass([y1], [aff1], [wdw2], mask, [wpw2_t], bias2,
                           width=w, apply_relu=True, out_dtype=bf16)
    aff2 = _bn_scale_shift(st2, gamma2, beta2, count)

    # BN2 + ReLU epilogue in plain JAX on the cout-sliced view (fused by XLA
    # with the slice/reshape; no third full-width memory-bound pass).
    scale2 = aff2[:cout, 0][None, :, None]
    shift2 = aff2[:cout, 1][None, :, None]
    out = jnp.maximum(y2[:, :cout, :].astype(f32) * scale2 + shift2, 0.0)
    return out.reshape(n, cout, h, w)


# ---------------------------------------------------------------------------
# Deterministic parameter init (shapes from the module's __init__)
# ---------------------------------------------------------------------------
def init_params(key, in_channels, out_channels):
    def block(k, cin, cout):
        ks = jax.random.split(k, 6)
        return {
            "w_dw": 0.2 * jax.random.normal(ks[0], (3, 3, cin), jnp.float32),
            "b_dw": 0.05 * jax.random.normal(ks[1], (cin,), jnp.float32),
            "w_pw": 0.2 * jax.random.normal(ks[2], (cin, cout), jnp.float32),
            "b_pw": 0.05 * jax.random.normal(ks[3], (cout,), jnp.float32),
            "gamma": 1.0 + 0.1 * jax.random.normal(ks[4], (cout,), jnp.float32),
            "beta": 0.1 * jax.random.normal(ks[5], (cout,), jnp.float32),
        }
    k1, k2 = jax.random.split(key)
    return {"block1": block(k1, in_channels, out_channels),
            "block2": block(k2, out_channels, out_channels)}


# ---------------------------------------------------------------------------
# Pure-JAX f32 reference (PyTorch-faithful math) for the correctness check
# ---------------------------------------------------------------------------
def _ref_dsconv(x, p):  # x: (N, C, H, W)
    _, _, h, w = x.shape
    xpad = jnp.pad(x, ((0, 0), (0, 0), (1, 1), (1, 1)))
    acc = jnp.zeros_like(x)
    for ky in range(3):
        for kx in range(3):
            acc = acc + xpad[:, :, ky:ky + h, kx:kx + w] * \
                p["w_dw"][ky, kx][None, :, None, None]
    acc = acc + p["b_dw"][None, :, None, None]
    y = jnp.einsum("nchw,cd->ndhw", acc, p["w_pw"]) + p["b_pw"][None, :, None, None]
    mean = jnp.mean(y, axis=(0, 2, 3), keepdims=True)
    var = jnp.mean((y - mean) ** 2, axis=(0, 2, 3), keepdims=True)
    y = (y - mean) * jax.lax.rsqrt(var + BN_EPS)
    y = y * p["gamma"][None, :, None, None] + p["beta"][None, :, None, None]
    return jnp.maximum(y, 0.0)


def _ref_up(x1, x2, params):
    x1 = x1.astype(jnp.float32)
    x2 = x2.astype(jnp.float32)
    h, w = x2.shape[2], x2.shape[3]
    h1, w1 = x1.shape[2], x1.shape[3]
    ah = _bilinear_matrix(h1, 2 * h1)
    aw = _bilinear_matrix(w1, 2 * w1)
    x1u = jnp.einsum("Hh,nchw->ncHw", ah, x1)
    x1u = jnp.einsum("Ww,nchw->nchW", aw, x1u)
    diff_y = h - x1u.shape[2]
    diff_x = w - x1u.shape[3]
    x1u = jnp.pad(x1u, ((0, 0), (0, 0),
                        (diff_y // 2, diff_y - diff_y // 2),
                        (diff_x // 2, diff_x - diff_x // 2)))
    x = jnp.concatenate([x2, x1u], axis=1)
    y = _ref_dsconv(x, params["block1"])
    y = _ref_dsconv(y, params["block2"])
    return y


if __name__ == "__main__":
    key = jax.random.PRNGKey(0)
    kx1, kx2, kp = jax.random.split(key, 3)

    n = 2
    skip_ch = 4                      # channels of x2 (skip connection)
    low_ch = 4                       # channels of x1 (to be upsampled)
    in_channels = skip_ch + low_ch   # channels after concat
    out_channels = 4

    # PyTorch-convention NCHW inputs
    x1 = jax.random.normal(kx1, (n, low_ch, 8, 8), jnp.float32)       # low-res
    x2 = jax.random.normal(kx2, (n, skip_ch, 16, 16), jnp.float32)    # skip

    params = init_params(kp, in_channels, out_channels)

    out = jax.jit(up_forward)(x1, x2, params)
    out = jax.block_until_ready(out)
    assert out.shape == (n, out_channels, 16, 16), out.shape

    ref = jax.block_until_ready(_ref_up(x1, x2, params))
    err = float(jnp.max(jnp.abs(out - ref)))
    # tolerance accommodates the deliberate bf16 MXU operands and the bf16 HBM
    # intermediates (f32 accumulation / f32 BN stats); logic errors give O(1)
    # mismatches.
    assert err < 1e-1, f"max abs err {err}"
    print("KERNEL_OK")
</pallas_src>

<mosaic_0001>
module attributes {stable_mosaic.version = 11 : i64} {
  func.func private @main(%arg0: i32) attributes {dimension_semantics = [#tpu.dimension_semantics<core_parallel>], iteration_bounds = array<i64: 2>, tpu.core_type = #tpu.core_type<sc_scalar_subcore>, window_params = []} {
    return
  }
}

module attributes {stable_mosaic.version = 11 : i64} {
  func.func private @main(%arg0: i32) attributes {dimension_semantics = [#tpu.dimension_semantics<core_parallel>], iteration_bounds = array<i64: 2>, tpu.core_type = #tpu.core_type<sc_scalar_subcore>, window_params = []} {
    return
  }
}

module attributes {stable_mosaic.version = 11 : i64} {
  func.func @kernel(%arg0: i32, %arg1: memref<1x8x256xf32, #tpu.memory_space<vmem>>, %arg2: memref<1x8x256xf32, #tpu.memory_space<vmem>>, %arg3: memref<8x9xf32, #tpu.memory_space<vmem>>, %arg4: memref<8x9xf32, #tpu.memory_space<vmem>>, %arg5: memref<9x256xf32, #tpu.memory_space<vmem>>, %arg6: memref<8x8xbf16, #tpu.memory_space<vmem>>, %arg7: memref<8x8xbf16, #tpu.memory_space<vmem>>, %arg8: memref<8x1xf32, #tpu.memory_space<vmem>>, %arg9: memref<1x8x256xbf16, #tpu.memory_space<vmem>>, %arg10: memref<1x8x2xf32, #tpu.memory_space<vmem>>) attributes {dimension_semantics = [#tpu.dimension_semantics<parallel>], iteration_bounds = array<i64: 2>, scalar_prefetch = 0 : i64, scratch_operands = 0 : i64, tpu.core_type = #tpu.core_type<tc>, window_params = [{transform_indices = @transform_0, window_bounds = array<i64: 1, 8, 256>}, {transform_indices = @transform_1, window_bounds = array<i64: 1, 8, 256>}, {pipeline_mode = #tpu.pipeline_mode<synchronous>, transform_indices = @transform_2, window_bounds = array<i64: 8, 9>}, {pipeline_mode = #tpu.pipeline_mode<synchronous>, transform_indices = @transform_3, window_bounds = array<i64: 8, 9>}, {pipeline_mode = #tpu.pipeline_mode<synchronous>, transform_indices = @transform_4, window_bounds = array<i64: 9, 256>}, {pipeline_mode = #tpu.pipeline_mode<synchronous>, transform_indices = @transform_5, window_bounds = array<i64: 8, 8>}, {pipeline_mode = #tpu.pipeline_mode<synchronous>, transform_indices = @transform_6, window_bounds = array<i64: 8, 8>}, {pipeline_mode = #tpu.pipeline_mode<synchronous>, transform_indices = @transform_7, window_bounds = array<i64: 8, 1>}, {transform_indices = @transform_8, window_bounds = array<i64: 1, 8, 256>}, {transform_indices = @transform_9, window_bounds = array<i64: 1, 8, 2>}]} {
    %c0 = arith.constant 0 : index
    %c0_0 = arith.constant 0 : index
    %0 = vector.load %arg5[%c0, %c0_0] : memref<9x256xf32, #tpu.memory_space<vmem>>, vector<9x256xf32>
    %c0_1 = arith.constant 0 : index
    %c0_2 = arith.constant 0 : index
    %c0_3 = arith.constant 0 : index
    %1 = vector.load %arg1[%c0_1, %c0_2, %c0_3] : memref<1x8x256xf32, #tpu.memory_space<vmem>>, vector<1x8x256xf32>
    %2 = vector.shape_cast %1 : vector<1x8x256xf32> to vector<8x256xf32>
    %c0_4 = arith.constant 0 : index
    %c0_5 = arith.constant 0 : index
    %3 = vector.load %arg3[%c0_4, %c0_5] : memref<8x9xf32, #tpu.memory_space<vmem>>, vector<8x9xf32>
    %4 = vector.extract_strided_slice %3 {offsets = [0, 4], sizes = [8, 1], strides = [1, 1]} : vector<8x9xf32> to vector<8x1xf32>
    %5 = vector.broadcast %4 : vector<8x1xf32> to vector<8x256xf32>
    %6 = arith.mulf %2, %5 : vector<8x256xf32>
    %c17_i32 = arith.constant 17 : i32
    %7 = tpu.dynamic_rotate %2 by %c17_i32 dim 1 : vector<8x256xf32>, i32 -> vector<8x256xf32>
    %8 = vector.extract_strided_slice %0 {offsets = [0, 0], sizes = [1, 256], strides = [1, 1]} : vector<9x256xf32> to vector<1x256xf32>
    %9 = vector.broadcast %8 : vector<1x256xf32> to vector<8x256xf32>
    %10 = arith.mulf %7, %9 : vector<8x256xf32>
    %11 = vector.extract_strided_slice %3 {offsets = [0, 0], sizes = [8, 1], strides = [1, 1]} : vector<8x9xf32> to vector<8x1xf32>
    %12 = vector.broadcast %11 : vector<8x1xf32> to vector<8x256xf32>
    %13 = arith.mulf %10, %12 : vector<8x256xf32>
    %14 = arith.addf %6, %13 : vector<8x256xf32>
    %c16_i32 = arith.constant 16 : i32
    %15 = tpu.dynamic_rotate %2 by %c16_i32 dim 1 : vector<8x256xf32>, i32 -> vector<8x256xf32>
    %16 = vector.extract_strided_slice %0 {offsets = [1, 0], sizes = [1, 256], strides = [1, 1]} : vector<9x256xf32> to vector<1x256xf32>
    %17 = vector.broadcast %16 : vector<1x256xf32> to vector<8x256xf32>
    %18 = arith.mulf %15, %17 : vector<8x256xf32>
    %19 = vector.extract_strided_slice %3 {offsets = [0, 1], sizes = [8, 1], strides = [1, 1]} : vector<8x9xf32> to vector<8x1xf32>
    %20 = vector.broadcast %19 : vector<8x1xf32> to vector<8x256xf32>
    %21 = arith.mulf %18, %20 : vector<8x256xf32>
    %22 = arith.addf %14, %21 : vector<8x256xf32>
    %c15_i32 = arith.constant 15 : i32
    %23 = tpu.dynamic_rotate %2 by %c15_i32 dim 1 : vector<8x256xf32>, i32 -> vector<8x256xf32>
    %24 = vector.extract_strided_slice %0 {offsets = [2, 0], sizes = [1, 256], strides = [1, 1]} : vector<9x256xf32> to vector<1x256xf32>
    %25 = vector.broadcast %24 : vector<1x256xf32> to vector<8x256xf32>
    %26 = arith.mulf %23, %25 : vector<8x256xf32>
    %27 = vector.extract_strided_slice %3 {offsets = [0, 2], sizes = [8, 1], strides = [1, 1]} : vector<8x9xf32> to vector<8x1xf32>
    %28 = vector.broadcast %27 : vector<8x1xf32> to vector<8x256xf32>
    %29 = arith.mulf %26, %28 : vector<8x256xf32>
    %30 = arith.addf %22, %29 : vector<8x256xf32>
    %c1_i32 = arith.constant 1 : i32
    %31 = tpu.dynamic_rotate %2 by %c1_i32 dim 1 : vector<8x256xf32>, i32 -> vector<8x256xf32>
    %32 = vector.extract_strided_slice %0 {offsets = [3, 0], sizes = [1, 256], strides = [1, 1]} : vector<9x256xf32> to vector<1x256xf32>
    %33 = vector.broadcast %32 : vector<1x256xf32> to vector<8x256xf32>
    %34 = arith.mulf %31, %33 : vector<8x256xf32>
    %35 = vector.extract_strided_slice %3 {offsets = [0, 3], sizes = [8, 1], strides = [1, 1]} : vector<8x9xf32> to vector<8x1xf32>
    %36 = vector.broadcast %35 : vector<8x1xf32> to vector<8x256xf32>
    %37 = arith.mulf %34, %36 : vector<8x256xf32>
    %38 = arith.addf %30, %37 : vector<8x256xf32>
    %c255_i32 = arith.constant 255 : i32
    %39 = tpu.dynamic_rotate %2 by %c255_i32 dim 1 : vector<8x256xf32>, i32 -> vector<8x256xf32>
    %40 = vector.extract_strided_slice %0 {offsets = [5, 0], sizes = [1, 256], strides = [1, 1]} : vector<9x256xf32> to vector<1x256xf32>
    %41 = vector.broadcast %40 : vector<1x256xf32> to vector<8x256xf32>
    %42 = arith.mulf %39, %41 : vector<8x256xf32>
    %43 = vector.extract_strided_slice %3 {offsets = [0, 5], sizes = [8, 1], strides = [1, 1]} : vector<8x9xf32> to vector<8x1xf32>
    %44 = vector.broadcast %43 : vector<8x1xf32> to vector<8x256xf32>
    %45 = arith.mulf %42, %44 : vector<8x256xf32>
    %46 = arith.addf %38, %45 : vector<8x256xf32>
    %c241_i32 = arith.constant 241 : i32
    %47 = tpu.dynamic_rotate %2 by %c241_i32 dim 1 : vector<8x256xf32>, i32 -> vector<8x256xf32>
    %48 = vector.extract_strided_slice %0 {offsets = [6, 0], sizes = [1, 256], strides = [1, 1]} : vector<9x256xf32> to vector<1x256xf32>
    %49 = vector.broadcast %48 : vector<1x256xf32> to vector<8x256xf32>
    %50 = arith.mulf %47, %49 : vector<8x256xf32>
    %51 = vector.extract_strided_slice %3 {offsets = [0, 6], sizes = [8, 1], strides = [1, 1]} : vector<8x9xf32> to vector<8x1xf32>
    %52 = vector.broadcast %51 : vector<8x1xf32> to vector<8x256xf32>
    %53 = arith.mulf %50, %52 : vector<8x256xf32>
    %54 = arith.addf %46, %53 : vector<8x256xf32>
    %c240_i32 = arith.constant 240 : i32
    %55 = tpu.dynamic_rotate %2 by %c240_i32 dim 1 : vector<8x256xf32>, i32 -> vector<8x256xf32>
    %56 = vector.extract_strided_slice %0 {offsets = [7, 0], sizes = [1, 256], strides = [1, 1]} : vector<9x256xf32> to vector<1x256xf32>
    %57 = vector.broadcast %56 : vector<1x256xf32> to vector<8x256xf32>
    %58 = arith.mulf %55, %57 : vector<8x256xf32>
    %59 = vector.extract_strided_slice %3 {offsets = [0, 7], sizes = [8, 1], strides = [1, 1]} : vector<8x9xf32> to vector<8x1xf32>
    %60 = vector.broadcast %59 : vector<8x1xf32> to vector<8x256xf32>
    %61 = arith.mulf %58, %60 : vector<8x256xf32>
    %62 = arith.addf %54, %61 : vector<8x256xf32>
    %c239_i32 = arith.constant 239 : i32
    %63 = tpu.dynamic_rotate %2 by %c239_i32 dim 1 : vector<8x256xf32>, i32 -> vector<8x256xf32>
    %64 = vector.extract_strided_slice %0 {offsets = [8, 0], sizes = [1, 256], strides = [1, 1]} : vector<9x256xf32> to vector<1x256xf32>
    %65 = vector.broadcast %64 : vector<1x256xf32> to vector<8x256xf32>
    %66 = arith.mulf %63, %65 : vector<8x256xf32>
    %67 = vector.extract_strided_slice %3 {offsets = [0, 8], sizes = [8, 1], strides = [1, 1]} : vector<8x9xf32> to vector<8x1xf32>
    %68 = vector.broadcast %67 : vector<8x1xf32> to vector<8x256xf32>
    %69 = arith.mulf %66, %68 : vector<8x256xf32>
    %70 = arith.addf %62, %69 : vector<8x256xf32>
    %c0_6 = arith.constant 0 : index
    %c0_7 = arith.constant 0 : index
    %71 = vector.load %arg6[%c0_6, %c0_7] : memref<8x8xbf16, #tpu.memory_space<vmem>>, vector<8x8xbf16>
    %72 = arith.truncf %70 : vector<8x256xf32> to vector<8x256xbf16>
    %cst = arith.constant dense<0.000000e+00> : vector<8x256xf32>
    %73 = tpu.matmul %71, %72, %cst {dimension_numbers = #tpu.dot_dimension_numbers<[1], [0], [0], [1], [0, 0, 1, 1], [], []>} : vector<8x8xbf16>, vector<8x256xbf16>, vector<8x256xf32> -> vector<8x256xf32>
    %c0_8 = arith.constant 0 : index
    %c0_9 = arith.constant 0 : index
    %c0_10 = arith.constant 0 : index
    %74 = vector.load %arg2[%c0_8, %c0_9, %c0_10] : memref<1x8x256xf32, #tpu.memory_space<vmem>>, vector<1x8x256xf32>
    %75 = vector.shape_cast %74 : vector<1x8x256xf32> to vector<8x256xf32>
    %c0_11 = arith.constant 0 : index
    %c0_12 = arith.constant 0 : index
    %76 = vector.load %arg4[%c0_11, %c0_12] : memref<8x9xf32, #tpu.memory_space<vmem>>, vector<8x9xf32>
    %77 = vector.extract_strided_slice %76 {offsets = [0, 4], sizes = [8, 1], strides = [1, 1]} : vector<8x9xf32> to vector<8x1xf32>
    %78 = vector.broadcast %77 : vector<8x1xf32> to vector<8x256xf32>
    %79 = arith.mulf %75, %78 : vector<8x256xf32>
    %c17_i32_13 = arith.constant 17 : i32
    %80 = tpu.dynamic_rotate %75 by %c17_i32_13 dim 1 : vector<8x256xf32>, i32 -> vector<8x256xf32>
    %81 = vector.extract_strided_slice %0 {offsets = [0, 0], sizes = [1, 256], strides = [1, 1]} : vector<9x256xf32> to vector<1x256xf32>
    %82 = vector.broadcast %81 : vector<1x256xf32> to vector<8x256xf32>
    %83 = arith.mulf %80, %82 : vector<8x256xf32>
    %84 = vector.extract_strided_slice %76 {offsets = [0, 0], sizes = [8, 1], strides = [1, 1]} : vector<8x9xf32> to vector<8x1xf32>
    %85 = vector.broadcast %84 : vector<8x1xf32> to vector<8x256xf32>
    %86 = arith.mulf %83, %85 : vector<8x256xf32>
    %87 = arith.addf %79, %86 : vector<8x256xf32>
    %c16_i32_14 = arith.constant 16 : i32
    %88 = tpu.dynamic_rotate %75 by %c16_i32_14 dim 1 : vector<8x256xf32>, i32 -> vector<8x256xf32>
    %89 = vector.extract_strided_slice %0 {offsets = [1, 0], sizes = [1, 256], strides = [1, 1]} : vector<9x256xf32> to vector<1x256xf32>
    %90 = vector.broadcast %89 : vector<1x256xf32> to vector<8x256xf32>
    %91 = arith.mulf %88, %90 : vector<8x256xf32>
    %92 = vector.extract_strided_slice %76 {offsets = [0, 1], sizes = [8, 1], strides = [1, 1]} : vector<8x9xf32> to vector<8x1xf32>
    %93 = vector.broadcast %92 : vector<8x1xf32> to vector<8x256xf32>
    %94 = arith.mulf %91, %93 : vector<8x256xf32>
    %95 = arith.addf %87, %94 : vector<8x256xf32>
    %c15_i32_15 = arith.constant 15 : i32
    %96 = tpu.dynamic_rotate %75 by %c15_i32_15 dim 1 : vector<8x256xf32>, i32 -> vector<8x256xf32>
    %97 = vector.extract_strided_slice %0 {offsets = [2, 0], sizes = [1, 256], strides = [1, 1]} : vector<9x256xf32> to vector<1x256xf32>
    %98 = vector.broadcast %97 : vector<1x256xf32> to vector<8x256xf32>
    %99 = arith.mulf %96, %98 : vector<8x256xf32>
    %100 = vector.extract_strided_slice %76 {offsets = [0, 2], sizes = [8, 1], strides = [1, 1]} : vector<8x9xf32> to vector<8x1xf32>
    %101 = vector.broadcast %100 : vector<8x1xf32> to vector<8x256xf32>
    %102 = arith.mulf %99, %101 : vector<8x256xf32>
    %103 = arith.addf %95, %102 : vector<8x256xf32>
    %c1_i32_16 = arith.constant 1 : i32
    %104 = tpu.dynamic_rotate %75 by %c1_i32_16 dim 1 : vector<8x256xf32>, i32 -> vector<8x256xf32>
    %105 = vector.extract_strided_slice %0 {offsets = [3, 0], sizes = [1, 256], strides = [1, 1]} : vector<9x256xf32> to vector<1x256xf32>
    %106 = vector.broadcast %105 : vector<1x256xf32> to vector<8x256xf32>
    %107 = arith.mulf %104, %106 : vector<8x256xf32>
    %108 = vector.extract_strided_slice %76 {offsets = [0, 3], sizes = [8, 1], strides = [1, 1]} : vector<8x9xf32> to vector<8x1xf32>
    %109 = vector.broadcast %108 : vector<8x1xf32> to vector<8x256xf32>
    %110 = arith.mulf %107, %109 : vector<8x256xf32>
    %111 = arith.addf %103, %110 : vector<8x256xf32>
    %c255_i32_17 = arith.constant 255 : i32
    %112 = tpu.dynamic_rotate %75 by %c255_i32_17 dim 1 : vector<8x256xf32>, i32 -> vector<8x256xf32>
    %113 = vector.extract_strided_slice %0 {offsets = [5, 0], sizes = [1, 256], strides = [1, 1]} : vector<9x256xf32> to vector<1x256xf32>
    %114 = vector.broadcast %113 : vector<1x256xf32> to vector<8x256xf32>
    %115 = arith.mulf %112, %114 : vector<8x256xf32>
    %116 = vector.extract_strided_slice %76 {offsets = [0, 5], sizes = [8, 1], strides = [1, 1]} : vector<8x9xf32> to vector<8x1xf32>
    %117 = vector.broadcast %116 : vector<8x1xf32> to vector<8x256xf32>
    %118 = arith.mulf %115, %117 : vector<8x256xf32>
    %119 = arith.addf %111, %118 : vector<8x256xf32>
    %c241_i32_18 = arith.constant 241 : i32
    %120 = tpu.dynamic_rotate %75 by %c241_i32_18 dim 1 : vector<8x256xf32>, i32 -> vector<8x256xf32>
    %121 = vector.extract_strided_slice %0 {offsets = [6, 0], sizes = [1, 256], strides = [1, 1]} : vector<9x256xf32> to vector<1x256xf32>
    %122 = vector.broadcast %121 : vector<1x256xf32> to vector<8x256xf32>
    %123 = arith.mulf %120, %122 : vector<8x256xf32>
    %124 = vector.extract_strided_slice %76 {offsets = [0, 6], sizes = [8, 1], strides = [1, 1]} : vector<8x9xf32> to vector<8x1xf32>
    %125 = vector.broadcast %124 : vector<8x1xf32> to vector<8x256xf32>
    %126 = arith.mulf %123, %125 : vector<8x256xf32>
    %127 = arith.addf %119, %126 : vector<8x256xf32>
    %c240_i32_19 = arith.constant 240 : i32
    %128 = tpu.dynamic_rotate %75 by %c240_i32_19 dim 1 : vector<8x256xf32>, i32 -> vector<8x256xf32>
    %129 = vector.extract_strided_slice %0 {offsets = [7, 0], sizes = [1, 256], strides = [1, 1]} : vector<9x256xf32> to vector<1x256xf32>
    %130 = vector.broadcast %129 : vector<1x256xf32> to vector<8x256xf32>
    %131 = arith.mulf %128, %130 : vector<8x256xf32>
    %132 = vector.extract_strided_slice %76 {offsets = [0, 7], sizes = [8, 1], strides = [1, 1]} : vector<8x9xf32> to vector<8x1xf32>
    %133 = vector.broadcast %132 : vector<8x1xf32> to vector<8x256xf32>
    %134 = arith.mulf %131, %133 : vector<8x256xf32>
    %135 = arith.addf %127, %134 : vector<8x256xf32>
    %c239_i32_20 = arith.constant 239 : i32
    %136 = tpu.dynamic_rotate %75 by %c239_i32_20 dim 1 : vector<8x256xf32>, i32 -> vector<8x256xf32>
    %137 = vector.extract_strided_slice %0 {offsets = [8, 0], sizes = [1, 256], strides = [1, 1]} : vector<9x256xf32> to vector<1x256xf32>
    %138 = vector.broadcast %137 : vector<1x256xf32> to vector<8x256xf32>
    %139 = arith.mulf %136, %138 : vector<8x256xf32>
    %140 = vector.extract_strided_slice %76 {offsets = [0, 8], sizes = [8, 1], strides = [1, 1]} : vector<8x9xf32> to vector<8x1xf32>
    %141 = vector.broadcast %140 : vector<8x1xf32> to vector<8x256xf32>
    %142 = arith.mulf %139, %141 : vector<8x256xf32>
    %143 = arith.addf %135, %142 : vector<8x256xf32>
    %c0_21 = arith.constant 0 : index
    %c0_22 = arith.constant 0 : index
    %144 = vector.load %arg7[%c0_21, %c0_22] : memref<8x8xbf16, #tpu.memory_space<vmem>>, vector<8x8xbf16>
    %145 = arith.truncf %143 : vector<8x256xf32> to vector<8x256xbf16>
    %cst_23 = arith.constant dense<0.000000e+00> : vector<8x256xf32>
    %146 = tpu.matmul %144, %145, %cst_23 {dimension_numbers = #tpu.dot_dimension_numbers<[1], [0], [0], [1], [0, 0, 1, 1], [], []>} : vector<8x8xbf16>, vector<8x256xbf16>, vector<8x256xf32> -> vector<8x256xf32>
    %147 = arith.addf %73, %146 : vector<8x256xf32>
    %c0_24 = arith.constant 0 : index
    %c0_25 = arith.constant 0 : index
    %148 = vector.load %arg8[%c0_24, %c0_25] : memref<8x1xf32, #tpu.memory_space<vmem>>, vector<8x1xf32>
    %149 = vector.broadcast %148 : vector<8x1xf32> to vector<8x256xf32>
    %150 = arith.addf %147, %149 : vector<8x256xf32>
    %151 = arith.truncf %150 : vector<8x256xf32> to vector<8x256xbf16>
    %c0_26 = arith.constant 0 : index
    %c0_27 = arith.constant 0 : index
    %c0_28 = arith.constant 0 : index
    %152 = vector.load %arg9[%c0_26, %c0_27, %c0_28] : memref<1x8x256xbf16, #tpu.memory_space<vmem>>, vector<1x8x256xbf16>
    %153 = vector.shape_cast %152 : vector<1x8x256xbf16> to vector<8x256xbf16>
    %154 = vector.shape_cast %151 : vector<8x256xbf16> to vector<1x8x256xbf16>
    tpu.vector_store %arg9[%c0_26, %c0_27, %c0_28], %154 {strides = array<i32>} : memref<1x8x256xbf16, #tpu.memory_space<vmem>>, vector<1x8x256xbf16>,
    %cst_29 = arith.constant dense<0.000000e+00> : vector<8xf32>
    %155 = vector.multi_reduction <add>, %150, %cst_29 [1] : vector<8x256xf32> to vector<8xf32>
    %156 = vector.shape_cast %155 : vector<8xf32> to vector<8x1xf32>
    %c0_30 = arith.constant 0 : index
    %c0_31 = arith.constant 0 : index
    %c0_32 = arith.constant 0 : index
    %157 = vector.load %arg10[%c0_30, %c0_31, %c0_32] : memref<1x8x2xf32, #tpu.memory_space<vmem>>, vector<1x8x1xf32>
    %158 = vector.shape_cast %157 : vector<1x8x1xf32> to vector<8x1xf32>
    %159 = vector.shape_cast %156 : vector<8x1xf32> to vector<1x8x1xf32>
    tpu.vector_store %arg10[%c0_30, %c0_31, %c0_32], %159 {strides = array<i32>} : memref<1x8x2xf32, #tpu.memory_space<vmem>>, vector<1x8x1xf32>,
    %160 = arith.mulf %150, %150 : vector<8x256xf32>
    %cst_33 = arith.constant dense<0.000000e+00> : vector<8xf32>
    %161 = vector.multi_reduction <add>, %160, %cst_33 [1] : vector<8x256xf32> to vector<8xf32>
    %162 = vector.shape_cast %161 : vector<8xf32> to vector<8x1xf32>
    %c0_34 = arith.constant 0 : index
    %c0_35 = arith.constant 0 : index
    %c1 = arith.constant 1 : index
    %163 = vector.load %arg10[%c0_34, %c0_35, %c1] : memref<1x8x2xf32, #tpu.memory_space<vmem>>, vector<1x8x1xf32>
    %164 = vector.shape_cast %163 : vector<1x8x1xf32> to vector<8x1xf32>
    %165 = vector.shape_cast %162 : vector<8x1xf32> to vector<1x8x1xf32>
    tpu.vector_store %arg10[%c0_34, %c0_35, %c1], %165 {strides = array<i32>} : memref<1x8x2xf32, #tpu.memory_space<vmem>>, vector<1x8x1xf32>,
    return
  }
  func.func @transform_0(%arg0: i32) -> (i32, i32, i32) {
    %c0_i32 = arith.constant 0 : i32
    %c0_i32_0 = arith.constant 0 : i32
    %c0_i32_1 = arith.constant 0 : i32
    return %arg0, %c0_i32, %c0_i32_0 : i32, i32, i32
  }
  func.func @transform_1(%arg0: i32) -> (i32, i32, i32) {
    %c0_i32 = arith.constant 0 : i32
    %c0_i32_0 = arith.constant 0 : i32
    %c0_i32_1 = arith.constant 0 : i32
    return %arg0, %c0_i32, %c0_i32_0 : i32, i32, i32
  }
  func.func @transform_2(%arg0: i32) -> (i32, i32) {
    %c0_i32 = arith.constant 0 : i32
    %c0_i32_0 = arith.constant 0 : i32
    %c0_i32_1 = arith.constant 0 : i32
    return %c0_i32, %c0_i32_0 : i32, i32
  }
  func.func @transform_3(%arg0: i32) -> (i32, i32) {
    %c0_i32 = arith.constant 0 : i32
    %c0_i32_0 = arith.constant 0 : i32
    %c0_i32_1 = arith.constant 0 : i32
    return %c0_i32, %c0_i32_0 : i32, i32
  }
  func.func @transform_4(%arg0: i32) -> (i32, i32) {
    %c0_i32 = arith.constant 0 : i32
    %c0_i32_0 = arith.constant 0 : i32
    %c0_i32_1 = arith.constant 0 : i32
    return %c0_i32, %c0_i32_0 : i32, i32
  }
  func.func @transform_5(%arg0: i32) -> (i32, i32) {
    %c0_i32 = arith.constant 0 : i32
    %c0_i32_0 = arith.constant 0 : i32
    %c0_i32_1 = arith.constant 0 : i32
    return %c0_i32, %c0_i32_0 : i32, i32
  }
  func.func @transform_6(%arg0: i32) -> (i32, i32) {
    %c0_i32 = arith.constant 0 : i32
    %c0_i32_0 = arith.constant 0 : i32
    %c0_i32_1 = arith.constant 0 : i32
    return %c0_i32, %c0_i32_0 : i32, i32
  }
  func.func @transform_7(%arg0: i32) -> (i32, i32) {
    %c0_i32 = arith.constant 0 : i32
    %c0_i32_0 = arith.constant 0 : i32
    %c0_i32_1 = arith.constant 0 : i32
    return %c0_i32, %c0_i32_0 : i32, i32
  }
  func.func @transform_8(%arg0: i32) -> (i32, i32, i32) {
    %c0_i32 = arith.constant 0 : i32
    %c0_i32_0 = arith.constant 0 : i32
    %c0_i32_1 = arith.constant 0 : i32
    return %arg0, %c0_i32, %c0_i32_0 : i32, i32, i32
  }
  func.func @transform_9(%arg0: i32) -> (i32, i32, i32) {
    %c0_i32 = arith.constant 0 : i32
    %c0_i32_0 = arith.constant 0 : i32
    %c0_i32_1 = arith.constant 0 : i32
    return %arg0, %c0_i32, %c0_i32_0 : i32, i32, i32
  }
}

module attributes {stable_mosaic.version = 11 : i64} {
  func.func @kernel(%arg0: i32, %arg1: memref<1x8x256xbf16, #tpu.memory_space<vmem>>, %arg2: memref<8x2xf32, #tpu.memory_space<vmem>>, %arg3: memref<8x9xf32, #tpu.memory_space<vmem>>, %arg4: memref<9x256xf32, #tpu.memory_space<vmem>>, %arg5: memref<8x8xbf16, #tpu.memory_space<vmem>>, %arg6: memref<8x1xf32, #tpu.memory_space<vmem>>, %arg7: memref<1x8x256xbf16, #tpu.memory_space<vmem>>, %arg8: memref<1x8x2xf32, #tpu.memory_space<vmem>>) attributes {dimension_semantics = [#tpu.dimension_semantics<parallel>], iteration_bounds = array<i64: 2>, scalar_prefetch = 0 : i64, scratch_operands = 0 : i64, tpu.core_type = #tpu.core_type<tc>, window_params = [{transform_indices = @transform_0, window_bounds = array<i64: 1, 8, 256>}, {pipeline_mode = #tpu.pipeline_mode<synchronous>, transform_indices = @transform_1, window_bounds = array<i64: 8, 2>}, {pipeline_mode = #tpu.pipeline_mode<synchronous>, transform_indices = @transform_2, window_bounds = array<i64: 8, 9>}, {pipeline_mode = #tpu.pipeline_mode<synchronous>, transform_indices = @transform_3, window_bounds = array<i64: 9, 256>}, {pipeline_mode = #tpu.pipeline_mode<synchronous>, transform_indices = @transform_4, window_bounds = array<i64: 8, 8>}, {pipeline_mode = #tpu.pipeline_mode<synchronous>, transform_indices = @transform_5, window_bounds = array<i64: 8, 1>}, {transform_indices = @transform_6, window_bounds = array<i64: 1, 8, 256>}, {transform_indices = @transform_7, window_bounds = array<i64: 1, 8, 2>}]} {
    %c0 = arith.constant 0 : index
    %c0_0 = arith.constant 0 : index
    %0 = vector.load %arg4[%c0, %c0_0] : memref<9x256xf32, #tpu.memory_space<vmem>>, vector<9x256xf32>
    %c0_1 = arith.constant 0 : index
    %c0_2 = arith.constant 0 : index
    %c0_3 = arith.constant 0 : index
    %1 = vector.load %arg1[%c0_1, %c0_2, %c0_3] : memref<1x8x256xbf16, #tpu.memory_space<vmem>>, vector<1x8x256xbf16>
    %2 = vector.shape_cast %1 : vector<1x8x256xbf16> to vector<8x256xbf16>
    %3 = arith.extf %2 : vector<8x256xbf16> to vector<8x256xf32>
    %c0_4 = arith.constant 0 : index
    %c0_5 = arith.constant 0 : index
    %4 = vector.load %arg2[%c0_4, %c0_5] : memref<8x2xf32, #tpu.memory_space<vmem>>, vector<8x1xf32>
    %5 = vector.broadcast %4 : vector<8x1xf32> to vector<8x256xf32>
    %6 = arith.mulf %3, %5 : vector<8x256xf32>
    %c0_6 = arith.constant 0 : index
    %c1 = arith.constant 1 : index
    %7 = vector.load %arg2[%c0_6, %c1] : memref<8x2xf32, #tpu.memory_space<vmem>>, vector<8x1xf32>
    %8 = vector.broadcast %7 : vector<8x1xf32> to vector<8x256xf32>
    %9 = arith.addf %6, %8 : vector<8x256xf32>
    %cst = arith.constant 0.000000e+00 : f32
    %10 = vector.broadcast %cst : f32 to vector<8x256xf32>
    %11 = arith.maximumf %9, %10 : vector<8x256xf32>
    %c0_7 = arith.constant 0 : index
    %c0_8 = arith.constant 0 : index
    %12 = vector.load %arg3[%c0_7, %c0_8] : memref<8x9xf32, #tpu.memory_space<vmem>>, vector<8x9xf32>
    %13 = vector.extract_strided_slice %12 {offsets = [0, 4], sizes = [8, 1], strides = [1, 1]} : vector<8x9xf32> to vector<8x1xf32>
    %14 = vector.broadcast %13 : vector<8x1xf32> to vector<8x256xf32>
    %15 = arith.mulf %11, %14 : vector<8x256xf32>
    %c17_i32 = arith.constant 17 : i32
    %16 = tpu.dynamic_rotate %11 by %c17_i32 dim 1 : vector<8x256xf32>, i32 -> vector<8x256xf32>
    %17 = vector.extract_strided_slice %0 {offsets = [0, 0], sizes = [1, 256], strides = [1, 1]} : vector<9x256xf32> to vector<1x256xf32>
    %18 = vector.broadcast %17 : vector<1x256xf32> to vector<8x256xf32>
    %19 = arith.mulf %16, %18 : vector<8x256xf32>
    %20 = vector.extract_strided_slice %12 {offsets = [0, 0], sizes = [8, 1], strides = [1, 1]} : vector<8x9xf32> to vector<8x1xf32>
    %21 = vector.broadcast %20 : vector<8x1xf32> to vector<8x256xf32>
    %22 = arith.mulf %19, %21 : vector<8x256xf32>
    %23 = arith.addf %15, %22 : vector<8x256xf32>
    %c16_i32 = arith.constant 16 : i32
    %24 = tpu.dynamic_rotate %11 by %c16_i32 dim 1 : vector<8x256xf32>, i32 -> vector<8x256xf32>
    %25 = vector.extract_strided_slice %0 {offsets = [1, 0], sizes = [1, 256], strides = [1, 1]} : vector<9x256xf32> to vector<1x256xf32>
    %26 = vector.broadcast %25 : vector<1x256xf32> to vector<8x256xf32>
    %27 = arith.mulf %24, %26 : vector<8x256xf32>
    %28 = vector.extract_strided_slice %12 {offsets = [0, 1], sizes = [8, 1], strides = [1, 1]} : vector<8x9xf32> to vector<8x1xf32>
    %29 = vector.broadcast %28 : vector<8x1xf32> to vector<8x256xf32>
    %30 = arith.mulf %27, %29 : vector<8x256xf32>
    %31 = arith.addf %23, %30 : vector<8x256xf32>
    %c15_i32 = arith.constant 15 : i32
    %32 = tpu.dynamic_rotate %11 by %c15_i32 dim 1 : vector<8x256xf32>, i32 -> vector<8x256xf32>
    %33 = vector.extract_strided_slice %0 {offsets = [2, 0], sizes = [1, 256], strides = [1, 1]} : vector<9x256xf32> to vector<1x256xf32>
    %34 = vector.broadcast %33 : vector<1x256xf32> to vector<8x256xf32>
    %35 = arith.mulf %32, %34 : vector<8x256xf32>
    %36 = vector.extract_strided_slice %12 {offsets = [0, 2], sizes = [8, 1], strides = [1, 1]} : vector<8x9xf32> to vector<8x1xf32>
    %37 = vector.broadcast %36 : vector<8x1xf32> to vector<8x256xf32>
    %38 = arith.mulf %35, %37 : vector<8x256xf32>
    %39 = arith.addf %31, %38 : vector<8x256xf32>
    %c1_i32 = arith.constant 1 : i32
    %40 = tpu.dynamic_rotate %11 by %c1_i32 dim 1 : vector<8x256xf32>, i32 -> vector<8x256xf32>
    %41 = vector.extract_strided_slice %0 {offsets = [3, 0], sizes = [1, 256], strides = [1, 1]} : vector<9x256xf32> to vector<1x256xf32>
    %42 = vector.broadcast %41 : vector<1x256xf32> to vector<8x256xf32>
    %43 = arith.mulf %40, %42 : vector<8x256xf32>
    %44 = vector.extract_strided_slice %12 {offsets = [0, 3], sizes = [8, 1], strides = [1, 1]} : vector<8x9xf32> to vector<8x1xf32>
    %45 = vector.broadcast %44 : vector<8x1xf32> to vector<8x256xf32>
    %46 = arith.mulf %43, %45 : vector<8x256xf32>
    %47 = arith.addf %39, %46 : vector<8x256xf32>
    %c255_i32 = arith.constant 255 : i32
    %48 = tpu.dynamic_rotate %11 by %c255_i32 dim 1 : vector<8x256xf32>, i32 -> vector<8x256xf32>
    %49 = vector.extract_strided_slice %0 {offsets = [5, 0], sizes = [1, 256], strides = [1, 1]} : vector<9x256xf32> to vector<1x256xf32>
    %50 = vector.broadcast %49 : vector<1x256xf32> to vector<8x256xf32>
    %51 = arith.mulf %48, %50 : vector<8x256xf32>
    %52 = vector.extract_strided_slice %12 {offsets = [0, 5], sizes = [8, 1], strides = [1, 1]} : vector<8x9xf32> to vector<8x1xf32>
    %53 = vector.broadcast %52 : vector<8x1xf32> to vector<8x256xf32>
    %54 = arith.mulf %51, %53 : vector<8x256xf32>
    %55 = arith.addf %47, %54 : vector<8x256xf32>
    %c241_i32 = arith.constant 241 : i32
    %56 = tpu.dynamic_rotate %11 by %c241_i32 dim 1 : vector<8x256xf32>, i32 -> vector<8x256xf32>
    %57 = vector.extract_strided_slice %0 {offsets = [6, 0], sizes = [1, 256], strides = [1, 1]} : vector<9x256xf32> to vector<1x256xf32>
    %58 = vector.broadcast %57 : vector<1x256xf32> to vector<8x256xf32>
    %59 = arith.mulf %56, %58 : vector<8x256xf32>
    %60 = vector.extract_strided_slice %12 {offsets = [0, 6], sizes = [8, 1], strides = [1, 1]} : vector<8x9xf32> to vector<8x1xf32>
    %61 = vector.broadcast %60 : vector<8x1xf32> to vector<8x256xf32>
    %62 = arith.mulf %59, %61 : vector<8x256xf32>
    %63 = arith.addf %55, %62 : vector<8x256xf32>
    %c240_i32 = arith.constant 240 : i32
    %64 = tpu.dynamic_rotate %11 by %c240_i32 dim 1 : vector<8x256xf32>, i32 -> vector<8x256xf32>
    %65 = vector.extract_strided_slice %0 {offsets = [7, 0], sizes = [1, 256], strides = [1, 1]} : vector<9x256xf32> to vector<1x256xf32>
    %66 = vector.broadcast %65 : vector<1x256xf32> to vector<8x256xf32>
    %67 = arith.mulf %64, %66 : vector<8x256xf32>
    %68 = vector.extract_strided_slice %12 {offsets = [0, 7], sizes = [8, 1], strides = [1, 1]} : vector<8x9xf32> to vector<8x1xf32>
    %69 = vector.broadcast %68 : vector<8x1xf32> to vector<8x256xf32>
    %70 = arith.mulf %67, %69 : vector<8x256xf32>
    %71 = arith.addf %63, %70 : vector<8x256xf32>
    %c239_i32 = arith.constant 239 : i32
    %72 = tpu.dynamic_rotate %11 by %c239_i32 dim 1 : vector<8x256xf32>, i32 -> vector<8x256xf32>
    %73 = vector.extract_strided_slice %0 {offsets = [8, 0], sizes = [1, 256], strides = [1, 1]} : vector<9x256xf32> to vector<1x256xf32>
    %74 = vector.broadcast %73 : vector<1x256xf32> to vector<8x256xf32>
    %75 = arith.mulf %72, %74 : vector<8x256xf32>
    %76 = vector.extract_strided_slice %12 {offsets = [0, 8], sizes = [8, 1], strides = [1, 1]} : vector<8x9xf32> to vector<8x1xf32>
    %77 = vector.broadcast %76 : vector<8x1xf32> to vector<8x256xf32>
    %78 = arith.mulf %75, %77 : vector<8x256xf32>
    %79 = arith.addf %71, %78 : vector<8x256xf32>
    %c0_9 = arith.constant 0 : index
    %c0_10 = arith.constant 0 : index
    %80 = vector.load %arg5[%c0_9, %c0_10] : memref<8x8xbf16, #tpu.memory_space<vmem>>, vector<8x8xbf16>
    %81 = arith.truncf %79 : vector<8x256xf32> to vector<8x256xbf16>
    %cst_11 = arith.constant dense<0.000000e+00> : vector<8x256xf32>
    %82 = tpu.matmul %80, %81, %cst_11 {dimension_numbers = #tpu.dot_dimension_numbers<[1], [0], [0], [1], [0, 0, 1, 1], [], []>} : vector<8x8xbf16>, vector<8x256xbf16>, vector<8x256xf32> -> vector<8x256xf32>
    %c0_12 = arith.constant 0 : index
    %c0_13 = arith.constant 0 : index
    %83 = vector.load %arg6[%c0_12, %c0_13] : memref<8x1xf32, #tpu.memory_space<vmem>>, vector<8x1xf32>
    %84 = vector.broadcast %83 : vector<8x1xf32> to vector<8x256xf32>
    %85 = arith.addf %82, %84 : vector<8x256xf32>
    %86 = arith.truncf %85 : vector<8x256xf32> to vector<8x256xbf16>
    %c0_14 = arith.constant 0 : index
    %c0_15 = arith.constant 0 : index
    %c0_16 = arith.constant 0 : index
    %87 = vector.load %arg7[%c0_14, %c0_15, %c0_16] : memref<1x8x256xbf16, #tpu.memory_space<vmem>>, vector<1x8x256xbf16>
    %88 = vector.shape_cast %87 : vector<1x8x256xbf16> to vector<8x256xbf16>
    %89 = vector.shape_cast %86 : vector<8x256xbf16> to vector<1x8x256xbf16>
    tpu.vector_store %arg7[%c0_14, %c0_15, %c0_16], %89 {strides = array<i32>} : memref<1x8x256xbf16, #tpu.memory_space<vmem>>, vector<1x8x256xbf16>,
    %cst_17 = arith.constant dense<0.000000e+00> : vector<8xf32>
    %90 = vector.multi_reduction <add>, %85, %cst_17 [1] : vector<8x256xf32> to vector<8xf32>
    %91 = vector.shape_cast %90 : vector<8xf32> to vector<8x1xf32>
    %c0_18 = arith.constant 0 : index
    %c0_19 = arith.constant 0 : index
    %c0_20 = arith.constant 0 : index
    %92 = vector.load %arg8[%c0_18, %c0_19, %c0_20] : memref<1x8x2xf32, #tpu.memory_space<vmem>>, vector<1x8x1xf32>
    %93 = vector.shape_cast %92 : vector<1x8x1xf32> to vector<8x1xf32>
    %94 = vector.shape_cast %91 : vector<8x1xf32> to vector<1x8x1xf32>
    tpu.vector_store %arg8[%c0_18, %c0_19, %c0_20], %94 {strides = array<i32>} : memref<1x8x2xf32, #tpu.memory_space<vmem>>, vector<1x8x1xf32>,
    %95 = arith.mulf %85, %85 : vector<8x256xf32>
    %cst_21 = arith.constant dense<0.000000e+00> : vector<8xf32>
    %96 = vector.multi_reduction <add>, %95, %cst_21 [1] : vector<8x256xf32> to vector<8xf32>
    %97 = vector.shape_cast %96 : vector<8xf32> to vector<8x1xf32>
    %c0_22 = arith.constant 0 : index
    %c0_23 = arith.constant 0 : index
    %c1_24 = arith.constant 1 : index
    %98 = vector.load %arg8[%c0_22, %c0_23, %c1_24] : memref<1x8x2xf32, #tpu.memory_space<vmem>>, vector<1x8x1xf32>
    %99 = vector.shape_cast %98 : vector<1x8x1xf32> to vector<8x1xf32>
    %100 = vector.shape_cast %97 : vector<8x1xf32> to vector<1x8x1xf32>
    tpu.vector_store %arg8[%c0_22, %c0_23, %c1_24], %100 {strides = array<i32>} : memref<1x8x2xf32, #tpu.memory_space<vmem>>, vector<1x8x1xf32>,
    return
  }
  func.func @transform_0(%arg0: i32) -> (i32, i32, i32) {
    %c0_i32 = arith.constant 0 : i32
    %c0_i32_0 = arith.constant 0 : i32
    %c0_i32_1 = arith.constant 0 : i32
    return %arg0, %c0_i32, %c0_i32_0 : i32, i32, i32
  }
  func.func @transform_1(%arg0: i32) -> (i32, i32) {
    %c0_i32 = arith.constant 0 : i32
    %c0_i32_0 = arith.constant 0 : i32
    %c0_i32_1 = arith.constant 0 : i32
    return %c0_i32, %c0_i32_0 : i32, i32
  }
  func.func @transform_2(%arg0: i32) -> (i32, i32) {
    %c0_i32 = arith.constant 0 : i32
    %c0_i32_0 = arith.constant 0 : i32
    %c0_i32_1 = arith.constant 0 : i32
    return %c0_i32, %c0_i32_0 : i32, i32
  }
  func.func @transform_3(%arg0: i32) -> (i32, i32) {
    %c0_i32 = arith.constant 0 : i32
    %c0_i32_0 = arith.constant 0 : i32
    %c0_i32_1 = arith.constant 0 : i32
    return %c0_i32, %c0_i32_0 : i32, i32
  }
  func.func @transform_4(%arg0: i32) -> (i32, i32) {
    %c0_i32 = arith.constant 0 : i32
    %c0_i32_0 = arith.constant 0 : i32
    %c0_i32_1 = arith.constant 0 : i32
    return %c0_i32, %c0_i32_0 : i32, i32
  }
  func.func @transform_5(%arg0: i32) -> (i32, i32) {
    %c0_i32 = arith.constant 0 : i32
    %c0_i32_0 = arith.constant 0 : i32
    %c0_i32_1 = arith.constant 0 : i32
    return %c0_i32, %c0_i32_0 : i32, i32
  }
  func.func @transform_6(%arg0: i32) -> (i32, i32, i32) {
    %c0_i32 = arith.constant 0 : i32
    %c0_i32_0 = arith.constant 0 : i32
    %c0_i32_1 = arith.constant 0 : i32
    return %arg0, %c0_i32, %c0_i32_0 : i32, i32, i32
  }
  func.func @transform_7(%arg0: i32) -> (i32, i32, i32) {
    %c0_i32 = arith.constant 0 : i32
    %c0_i32_0 = arith.constant 0 : i32
    %c0_i32_1 = arith.constant 0 : i32
    return %arg0, %c0_i32, %c0_i32_0 : i32, i32, i32
  }
}

</mosaic_0001>

<bundles_post_ra>
// kernel: up_forward.2
= control target key start
LH: loop header
LB: loop body
LE: loop exit
PB: predicated region body
PF: predicated region fallthrough
CT: control target
= control target key end

     0   :  { %s1095_s30 = smov 0   ;;  %s1381_s0 = inlined_call_operand.vmem [shape: f32[2,8,256], index: 0, kind: input, shape index: {}]   ;;  %s1382_s1 = inlined_call_operand.vmem [shape: f32[2,8,256], index: 1, kind: input, shape index: {}]   ;;  %s1383_s2 = inlined_call_operand.vmem [shape: f32[8,9], index: 2, kind: input, shape index: {}]   ;;  %s1384_s3 = inlined_call_operand.vmem [shape: f32[8,9], index: 3, kind: input, shape index: {}]   ;;  %s1385_s4 = inlined_call_operand.vmem [shape: f32[9,256], index: 4, kind: input, shape index: {}]   ;;  %s1386_s5 = inlined_call_operand.vmem [shape: bf16[8,8], index: 5, kind: input, shape index: {}]   ;;  %s1387_s6 = inlined_call_operand.vmem [shape: bf16[8,8], index: 6, kind: input, shape index: {}]   ;;  %s1388_s7 = inlined_call_operand.vmem [shape: f32[8,1], index: 7, kind: input, shape index: {}]   ;;  %s1389_s8 = inlined_call_operand.vmem [shape: bf16[2,8,256], index: 8, kind: output, shape index: {0}]   ;;  %s1390_s9 = inlined_call_operand.vmem [shape: f32[2,8,2], index: 9, kind: output, shape index: {1}]  }
   0x1 LB: > { %s954_s10 = sadd.s32 4294967295, %s1026_s30   ;;  %p958_p0 = scmp.ge.s32.totalorder %s1026_s30, 1  ;;  %s1026_s30 = sphi %s1095_s30, %s20_s30  }
   0x2   : > { %p300_p1 = scmp.lt.s32.totalorder %s1026_s30, 3 }
   0x4   : > { %p301_p2 = pnand %p958_p0, %p300_p1 }
   0x5   : > { %v1106_v0 = vld [vmem:[%s1384_s3] sm:$0xff] (!%p301_p2)  ;;  %p345_p3 = scmp.lt.s32.totalorder (!%p301_p2), %s954_s10, 1  ;;  %v1028_v2 = vmov (!%p301_p2), 4   ;;  %v1029_v3 = vmov (!%p301_p2), 0   ;;  %v1030_v4 = vmov (!%p301_p2), 1   ;;  %s1031_s19 = smov (!%p301_p2), 17   ;;  %v383_v18 = vlaneseq (!%p301_p2) }
   0x6   : > { %304 = sbr.rel (%p301_p2) target bundleno = 626 (0x272), region = 52  ;;  %v1111_v1 = vld [vmem:[%s1383_s2] sm:$0xff] (!%p301_p2)  ;;  %1006 = vset.pattern.permute.xlu1 (!%p301_p2), %v1028_v2  ;;  %1004 = vset.pattern.permute.xlu0 (!%p301_p2), %v1028_v2  ;;  %v1032_v6 = vmov (!%p301_p2), 2   ;;  %v1033_v8 = vmov (!%p301_p2), 3   ;;  %s1034_s23 = smov (!%p301_p2), 16   ;;  %v1035_v11 = vmov (!%p301_p2), 5  }
   0x7   : > { %589 = vperm.xlu1 (!%p301_p2), %1006, %v1106_v0   ;;  %374 = vperm.xlu0 (!%p301_p2), %1004, %v1111_v1   ;;  %v1036_v12 = vmov (!%p301_p2), 6   ;;  %s1037_s24 = smov (!%p301_p2), 15   ;;  %s1038_s25 = smov (!%p301_p2), 1   ;;  %v1039_v13 = vmov (!%p301_p2), 7   ;;  %v1041_v14 = vmov (!%p301_p2), 8   ;;  %v827_v17 = vld [vmem:[%s1388_s7] sm:$0xff] (!%p301_p2) }
   0x8   : > { %818 = vmatprep.mubr.bf16.mxu1 (!%p301_p2), %v1029_v3  ;;  %768 = vmatprep.mubr.bf16.mxu0 (!%p301_p2), %v1029_v3  ;;  %s1040_s26 = smov (!%p301_p2), 113   ;;  %s1042_s27 = smov (!%p301_p2), 127   ;;  %v1188_v21 = vshrl.u32 (!%p301_p2), %v383_v18, 7  ;;  %v1190_v24 = vand.u32 (!%p301_p2), 127, %v383_v18  ;;  %v1196_v26 = vld [vmem:[%s1385_s4] sm:$0xff] (!%p301_p2)  ;;  %v1201_v27 = vld [vmem:[%s1385_s4 + $0x8] sm:$0xff] (!%p301_p2) }
   0x9   : > { %s1043_s28 = smov (!%p301_p2), 112   ;;  %s1044_s29 = smov (!%p301_p2), 111   ;;  %vm729_vm8 = vcmask (!%p301_p2), 1043456   ;;  %vm725_vm9 = vcmask (!%p301_p2), 64512   ;;  %vm847_vm10 = vcmask (!%p301_p2), 7168   ;;  %vm854_vm11 = vcmask (!%p301_p2), 15368  }
   0xa   : > { %v390_v25 = vsub.s32 (!%p301_p2), 0, %v1188_v21  ;;  %vm385_vm0 = vcmp.lt.s32.totalorder (!%p301_p2), %v1190_v24, 17  ;;  %v415_v45 = vsub.s32 (!%p301_p2), 1, %v1188_v21  ;;  %vm410_vm1 = vcmp.lt.s32.totalorder (!%p301_p2), %v1190_v24, 16 }
   0xb   : > { %1007 = vset.pattern.permute.xlu1 (!%p301_p2), %v1029_v3  ;;  %1005 = vset.pattern.permute.xlu0 (!%p301_p2), %v1029_v3  ;;  %vm435_vm2 = vcmp.lt.s32.totalorder (!%p301_p2), %v1190_v24, 15  ;;  %vm460_vm3 = vcmp.lt.s32.totalorder (!%p301_p2), %v1190_v24, 1  ;;  %vm485_vm4 = vcmp.lt.s32.totalorder (!%p301_p2), %v1190_v24, 127  ;;  %vm510_vm5 = vcmp.lt.s32.totalorder (!%p301_p2), %v1190_v24, 113 }
   0xc   : > { %603 = vperm.xlu1 (!%p301_p2), %1007, %v1106_v0   ;;  %399 = vperm.xlu0 (!%p301_p2), %1005, %v1111_v1   ;;  %v391_v29 = vrot.slane (!%p301_p2), %v1196_v26, %v390_v25  ;;  %v395_v30 = vrot.slane (!%p301_p2), %v1201_v27, %v390_v25  ;;  %v416_v52 = vrot.slane (!%p301_p2), %v1196_v26, %v415_v45  ;;  %vm535_vm6 = vcmp.lt.s32.totalorder (!%p301_p2), %v1190_v24, 112 }
   0xd   : > { %s1392_s10 = smov (!%p345_p3, %s954_s10), 1  ;;  %v420_v53 = vrot.slane %v1201_v27, %v415_v45  ;;  %vm560_vm7 = vcmp.lt.s32.totalorder %v1190_v24, 111 }
   0xe   : > { %s975_s15 = sshll.u32 %s1392_s10, 4 }
   0xf   : > { %s349_s18 = scalar_lea.vmem %s1381_s0, %s975_s15  ;;  %s354_s22 = scalar_lea.vmem %s1382_s1, %s975_s15 }
  0x10   : > { %1008 = vset.pattern.permute.xlu1 %v1030_v4  ;;  %1009 = vset.pattern.permute.xlu0 %v1030_v4  ;;  %v1129_v5 = vld [vmem:[%s349_s18] sm:$0xff]  ;;  %v1132_v7 = vld [vmem:[%s349_s18 + $0x8] sm:$0xff] }
  0x11   : > { %424 = vperm.xlu1 %1008, %v1111_v1   ;;  %619 = vperm.xlu0 %1009, %v1106_v0   ;;  %v1139_v9 = vld [vmem:[%s354_s22] sm:$0xff]  ;;  %v1143_v10 = vld [vmem:[%s354_s22 + $0x8] sm:$0xff] }
  0x15   : > { %379 = vrot.lane.b32.xlu1 %v1129_v5, %s1031_s19  ;;  %1010 = vset.pattern.permute.xlu0 %v1032_v6 }
  0x16   : > { %449 = vperm.xlu0 %1010, %v1111_v1   ;;  %1011 = vset.pattern.permute.xlu1 %v1033_v8 }
  0x19   : > { %381 = vrot.lane.b32.xlu1 %v1132_v7, %s1031_s19 }
  0x1a   : > { %635 = vperm.xlu0 %1010, %v1106_v0  }
  0x1d   : > { %594 = vrot.lane.b32.xlu1 %v1139_v9, %s1031_s19 }
  0x1e   : > { %408 = vrot.lane.b32.xlu0 %v1132_v7, %s1034_s23 }
  0x1f   : > { %1012 = vset.pattern.permute.xlu0 %v1033_v8 }
  0x21   : > { %596 = vrot.lane.b32.xlu1 %v1143_v10, %s1031_s19 }
  0x22   : > { %610 = vrot.lane.b32.xlu0 %v1139_v9, %s1034_s23 }
  0x25   : > { %406 = vrot.lane.b32.xlu1 %v1129_v5, %s1034_s23 }
  0x26   : > { %651 = vperm.xlu0 %1012, %v1106_v0  }
  0x29   : > { %474 = vperm.xlu1 %1011, %v1111_v1  }
  0x2a   : > { %1013 = vset.pattern.permute.xlu0 %v1035_v11 }
  0x2b   : > { %499 = vperm.xlu0 %1013, %v1111_v1  }
  0x2d   : > { %612 = vrot.lane.b32.xlu1 %v1143_v10, %s1034_s23 }
  0x2e   : > { %1014 = vset.pattern.permute.xlu1 %v1036_v12 }
  0x2f   : > { %667 = vperm.xlu0 %1013, %v1106_v0  }
  0x31   : > { %431 = vrot.lane.b32.xlu1 %v1129_v5, %s1037_s24 }
  0x33   : > { %458 = vrot.lane.b32.xlu0 %v1132_v7, %s1038_s25 }
  0x34   : > { %1015 = vset.pattern.permute.xlu0 %v1036_v12 }
  0x35   : > { %433 = vrot.lane.b32.xlu1 %v1132_v7, %s1037_s24 }
  0x37   : > { %642 = vrot.lane.b32.xlu0 %v1139_v9, %s1038_s25 }
  0x39   : > { %626 = vrot.lane.b32.xlu1 %v1139_v9, %s1037_s24 }
  0x3b   : > { %683 = vperm.xlu0 %1015, %v1106_v0  }
  0x3d   : > { %628 = vrot.lane.b32.xlu1 %v1143_v10, %s1037_s24 }
  0x3f   : > { %1016 = vset.pattern.permute.xlu0 %v1039_v13 }
  0x40   : > { %549 = vperm.xlu0 %1016, %v1111_v1  }
  0x41   : > { %456 = vrot.lane.b32.xlu1 %v1129_v5, %s1038_s25 }
  0x44   : > { %699 = vperm.xlu0 %1016, %v1106_v0  }
  0x45   : > { %524 = vperm.xlu1 %1014, %v1111_v1  }
  0x48   : > { %508 = vrot.lane.b32.xlu0 %v1132_v7, %s1040_s26 }
  0x49   : > { %644 = vrot.lane.b32.xlu1 %v1143_v10, %s1038_s25  ;;  %1018 = vset.pattern.permute.xlu0 %v1041_v14  ;;  %s977_s25 = sshll.u32 %s1392_s10, 3 }
  0x4a   : > { %1017 = vset.pattern.permute.xlu1 %v1041_v14  ;;  %s363_s12 = scalar_lea.vmem %s1390_s9, %s977_s25 }
  0x4c   : > { %674 = vrot.lane.b32.xlu0 %v1139_v9, %s1040_s26 }
  0x4d   : > { %481 = vrot.lane.b32.xlu1 %v1129_v5, %s1042_s27 }
  0x50   : > { %715 = vperm.xlu0 %1018, %v1106_v0  }
  0x51   : > { %483 = vrot.lane.b32.xlu1 %v1132_v7, %s1042_s27 }
  0x54   : > { %690 = vrot.lane.b32.xlu0 %v1139_v9, %s1043_s28 }
  0x55   : > { %658 = vrot.lane.b32.xlu1 %v1139_v9, %s1042_s27  ;;  %1019 = vset.pattern.permute.xlu0 %v1029_v3 }
  0x58   : > { %556 = vrot.lane.b32.xlu0 %v1129_v5, %s1044_s29 }
  0x59   : > { %660 = vrot.lane.b32.xlu1 %v1143_v10, %s1042_s27 }
  0x5c   : > { %706 = vrot.lane.b32.xlu0 %v1139_v9, %s1044_s29 }
  0x5d   : > { %506 = vrot.lane.b32.xlu1 %v1129_v5, %s1040_s26 }
  0x60   : > { %830 = vperm.xlu0 %1019, %v827_v17  }
  0x61   : > { %574 = vperm.xlu1 %1017, %v1111_v1  }
  0x65   : > { %676 = vrot.lane.b32.xlu1 %v1143_v10, %s1040_s26 }
  0x69   : > { %531 = vrot.lane.b32.xlu1 %v1129_v5, %s1043_s28 }
  0x6d   : > { %533 = vrot.lane.b32.xlu1 %v1132_v7, %s1043_s28 }
  0x71   : > { %692 = vrot.lane.b32.xlu1 %v1143_v10, %s1043_s28  ;;  %s359_s28 = scalar_lea.vmem %s1389_s8, %s977_s25 }
  0x75   : > { %558 = vrot.lane.b32.xlu1 %v1132_v7, %s1044_s29 }
  0x79   : > { %708 = vrot.lane.b32.xlu1 %v1143_v10, %s1044_s29 }
  0x86   : > { %v590_v15 = vpop.permute.xlu1 %589  ;;  %v375_v16 = vpop.permute.xlu0 %374 }
  0x87   : > { %v377_v35 = vmul.f32 %v375_v16, %v1129_v5  ;;  %v378_v36 = vmul.f32 %v375_v16, %v1132_v7  ;;  %v592_v54 = vmul.f32 %v590_v15, %v1139_v9  ;;  %v593_v55 = vmul.f32 %v590_v15, %v1143_v10 }
  0x8b   : > { %v604_v19 = vpop.permute.xlu1 %603  ;;  %v400_v20 = vpop.permute.xlu0 %399 }
  0x90   : > { %v425_v22 = vpop.permute.xlu1 %424  ;;  %v620_v23 = vpop.permute.xlu0 %619 }
  0x94   : > { %v380_v28 = vpop.permute.xlu1 %379 }
  0x95   : > { %v1206_v31 = vpop.permute.xlu0 %449 }
  0x98   : > { %v382_v32 = vpop.permute.xlu1 %381 }
  0x99   : > { %v386_v33 = vsel %vm385_vm0, %v380_v28, %v382_v32  ;;  %v387_v34 = vsel %vm385_vm0, %v382_v32, %v380_v28  ;;  %v1214_v42 = vpop.permute.xlu0 %635  ;;  %v465_v32 = vsub.s32 3, %v1188_v21 }
  0x9a   : > { %v396_v37 = vmul.f32 %v391_v29, %v387_v34  ;;  %v397_v38 = vmul.f32 %v395_v30, %v386_v33 }
  0x9c   : > { %v402_v39 = vmul.f32 %v400_v20, %v396_v37  ;;  %v403_v40 = vmul.f32 %v400_v20, %v397_v38  ;;  %v595_v41 = vpop.permute.xlu1 %594  ;;  %v466_v37 = vrot.slane %v1196_v26, %v465_v32  ;;  %v470_v38 = vrot.slane %v1201_v27, %v465_v32 }
  0x9d   : > { %v409_v51 = vpop.permute.xlu0 %408 }
  0x9e   : > { %v404_v43 = vadd.f32 %v402_v39, %v377_v35  ;;  %v405_v44 = vadd.f32 %v403_v40, %v378_v36 }
  0xa0   : > { %v597_v46 = vpop.permute.xlu1 %596 }
  0xa1   : > { %v598_v47 = vsel %vm385_vm0, %v595_v41, %v597_v46  ;;  %v599_v48 = vsel %vm385_vm0, %v597_v46, %v595_v41  ;;  %v611_v4 = vpop.permute.xlu0 %610 }
  0xa2   : > { %v600_v49 = vmul.f32 %v599_v48, %v391_v29  ;;  %v601_v50 = vmul.f32 %v598_v47, %v395_v30 }
  0xa4   : > { %v606_v56 = vmul.f32 %v604_v19, %v600_v49  ;;  %v607_v57 = vmul.f32 %v604_v19, %v601_v50  ;;  %v407_v58 = vpop.permute.xlu1 %406  ;;  %v440_v19 = vsub.s32 2, %v1188_v21 }
  0xa5   : > { %v411_v59 = vsel %vm410_vm1, %v407_v58, %v409_v51  ;;  %v412_v60 = vsel %vm410_vm1, %v409_v51, %v407_v58  ;;  %v1230_v8 = vpop.permute.xlu0 %651 }
  0xa6   : > { %v608_v61 = vadd.f32 %v606_v56, %v592_v54  ;;  %v609_v62 = vadd.f32 %v607_v57, %v593_v55  ;;  %v421_v63 = vmul.f32 %v416_v52, %v412_v60  ;;  %v422_v0 = vmul.f32 %v420_v53, %v411_v59 }
  0xa7   : > { %v445_v25 = vrot.slane %v1201_v27, %v440_v19 }
  0xa8   : > { %v427_v1 = vmul.f32 %v425_v22, %v421_v63  ;;  %v428_v2 = vmul.f32 %v425_v22, %v422_v0  ;;  %v475_v3 = vpop.permute.xlu1 %474  ;;  %v441_v22 = vrot.slane %v1196_v26, %v440_v19 }
  0xaa   : > { %v429_v5 = vadd.f32 %v427_v1, %v404_v43  ;;  %v430_v6 = vadd.f32 %v428_v2, %v405_v44  ;;  %v1240_v18 = vpop.permute.xlu0 %499  ;;  %v490_v2 = vsub.s32 5, %v1188_v21 }
  0xac   : > { %v613_v7 = vpop.permute.xlu1 %612 }
  0xad   : > { %v614_v9 = vsel %vm410_vm1, %v611_v4, %v613_v7  ;;  %v615_v10 = vsel %vm410_vm1, %v613_v7, %v611_v4 }
  0xae   : > { %v616_v11 = vmul.f32 %v615_v10, %v416_v52  ;;  %v617_v12 = vmul.f32 %v614_v9, %v420_v53  ;;  %v1246_v29 = vpop.permute.xlu0 %667 }
  0xb0   : > { %v622_v13 = vmul.f32 %v620_v23, %v616_v11  ;;  %v623_v14 = vmul.f32 %v620_v23, %v617_v12  ;;  %v432_v15 = vpop.permute.xlu1 %431  ;;  %v540_v11 = vsub.s32 7, %v1188_v21 }
  0xb2   : > { %v1236_v16 = vadd.f32 %v622_v13, %v608_v61  ;;  %v1238_v17 = vadd.f32 %v623_v14, %v609_v62  ;;  %v459_v36 = vpop.permute.xlu0 %458  ;;  %v491_v14 = vrot.slane %v1196_v26, %v490_v2 }
  0xb4   : > { %v434_v20 = vpop.permute.xlu1 %433 }
  0xb5   : > { %v436_v23 = vsel %vm435_vm2, %v432_v15, %v434_v20  ;;  %v437_v30 = vsel %vm435_vm2, %v434_v20, %v432_v15  ;;  %v495_v15 = vrot.slane %v1201_v27, %v490_v2 }
  0xb6   : > { %v446_v33 = vmul.f32 %v441_v22, %v437_v30  ;;  %v447_v34 = vmul.f32 %v445_v25, %v436_v23  ;;  %v643_v47 = vpop.permute.xlu0 %642 }
  0xb8   : > { %v627_v28 = vpop.permute.xlu1 %626  ;;  %v452_v39 = vmul.f32 %v1206_v31, %v446_v33  ;;  %v453_v40 = vmul.f32 %v1206_v31, %v447_v34 }
  0xba   : > { %v454_v48 = vadd.f32 %v452_v39, %v429_v5  ;;  %v455_v49 = vadd.f32 %v453_v40, %v430_v6  ;;  %v1268_v55 = vpop.permute.xlu0 %683  ;;  %v515_v5 = vsub.s32 6, %v1188_v21 }
  0xbc   : > { %v629_v35 = vpop.permute.xlu1 %628  ;;  %v516_v19 = vrot.slane %v1196_v26, %v515_v5  ;;  %v520_v20 = vrot.slane %v1201_v27, %v515_v5 }
  0xbd   : > { %v631_v4 = vsel %vm435_vm2, %v629_v35, %v627_v28 }
  0xbe   : > { %v632_v12 = vmul.f32 %v631_v4, %v441_v22  ;;  %v541_v22 = vrot.slane %v1196_v26, %v540_v11 }
  0xbf   : > { %v1270_v57 = vpop.permute.xlu0 %549 }
  0xc0   : > { %v457_v41 = vpop.permute.xlu1 %456  ;;  %v638_v34 = vmul.f32 %v1214_v42, %v632_v12  ;;  %v967_v12 = vld [vmem:[%s1385_s4 + $0x18] ss:$0 sm:$0xff] }
  0xc1   : > { %v461_v43 = vsel %vm460_vm3, %v457_v41, %v459_v36  ;;  %v462_v44 = vsel %vm460_vm3, %v459_v36, %v457_v41 }
  0xc2   : > { %v471_v45 = vmul.f32 %v466_v37, %v462_v44  ;;  %v472_v46 = vmul.f32 %v470_v38, %v461_v43 }
  0xc3   : > { %v1272_v59 = vpop.permute.xlu0 %699 }
  0xc4   : > { %v477_v50 = vmul.f32 %v475_v3, %v471_v45  ;;  %v478_v51 = vmul.f32 %v475_v3, %v472_v46  ;;  %v1262_v52 = vpop.permute.xlu1 %524  ;;  %v630_v3 = vsel %vm435_vm2, %v627_v28, %v629_v35 }
  0xc5   : > { %v633_v13 = vmul.f32 %v630_v3, %v445_v25  ;;  %v545_v25 = vrot.slane %v1201_v27, %v540_v11  ;;  %v966_v11 = vld [vmem:[%s1385_s4 + $0x10] ss:$0 sm:$0xff] }
  0xc6   : > { %v1264_v53 = vadd.f32 %v477_v50, %v454_v48  ;;  %v1266_v54 = vadd.f32 %v478_v51, %v455_v49  ;;  %v640_v49 = vadd.f32 %v638_v34, %v1236_v16 }
  0xc7   : > { %v509_v62 = vpop.permute.xlu0 %508  ;;  %v639_v35 = vmul.f32 %v1214_v42, %v633_v13 }
  0xc8   : > { %v645_v31 = vpop.permute.xlu1 %644 }
  0xc9   : > { %v646_v9 = vsel %vm460_vm3, %v643_v47, %v645_v31  ;;  %v647_v10 = vsel %vm460_vm3, %v645_v31, %v643_v47  ;;  %v641_v50 = vadd.f32 %v639_v35, %v1238_v17 }
  0xca   : > { %v648_v23 = vmul.f32 %v647_v10, %v466_v37  ;;  %v649_v30 = vmul.f32 %v646_v9, %v470_v38 }
  0xcb   : > { %v675_v0 = vpop.permute.xlu0 %674 }
  0xcc   : > { %v482_v56 = vpop.permute.xlu1 %481  ;;  %v654_v41 = vmul.f32 %v1230_v8, %v648_v23  ;;  %v655_v43 = vmul.f32 %v1230_v8, %v649_v30 }
  0xce   : > { %v657_v17 = vadd.f32 %v655_v43, %v641_v50  ;;  %v581_v50 = vld [vmem:[%s1386_s5] sm:$0xf] }
  0xcf   : > { %v1282_v7 = vpop.permute.xlu0 %715 }
  0xd0   : > { %v484_v58 = vpop.permute.xlu1 %483 }
  0xd1   : > { %v486_v32 = vsel %vm485_vm4, %v482_v56, %v484_v58  ;;  %v487_v21 = vsel %vm485_vm4, %v484_v58, %v482_v56 }
  0xd2   : > { %v496_v38 = vmul.f32 %v491_v14, %v486_v32  ;;  %v497_v39 = vmul.f32 %v495_v15, %v487_v21 }
  0xd3   : > { %v691_v33 = vpop.permute.xlu0 %690 }
  0xd4   : > { %v659_v60 = vpop.permute.xlu1 %658  ;;  %v502_v31 = vmul.f32 %v1240_v18, %v496_v38  ;;  %v503_v56 = vmul.f32 %v1240_v18, %v497_v39 }
  0xd6   : > { %v504_v13 = vadd.f32 %v502_v31, %v1264_v53 }
  0xd8   : > { %v661_v61 = vpop.permute.xlu1 %660 }
  0xd9   : > { %v662_v26 = vsel %vm485_vm4, %v659_v60, %v661_v61  ;;  %v663_v27 = vsel %vm485_vm4, %v661_v61, %v659_v60 }
  0xda   : > { %v664_v51 = vmul.f32 %v662_v26, %v491_v14  ;;  %v665_v8 = vmul.f32 %v663_v27, %v495_v15  ;;  %v505_v14 = vadd.f32 %v503_v56, %v1266_v54 }
  0xdc   : > { %v507_v63 = vpop.permute.xlu1 %506  ;;  %v670_v18 = vmul.f32 %v1246_v29, %v664_v51 }
  0xdd   : > { %v511_v36 = vsel %vm510_vm5, %v507_v63, %v509_v62  ;;  %v512_v37 = vsel %vm510_vm5, %v509_v62, %v507_v63  ;;  %v557_v62 = vpop.permute.xlu0 %556 }
  0xde   : > { %v521_v45 = vmul.f32 %v516_v19, %v511_v36  ;;  %v522_v46 = vmul.f32 %v520_v20, %v512_v37 }
  0xe0   : > { %v1274_v1 = vpop.permute.xlu1 %574  ;;  %v527_v4 = vmul.f32 %v1262_v52, %v521_v45  ;;  %v528_v5 = vmul.f32 %v1262_v52, %v522_v46 }
  0xe1   : > { %v707_v21 = vpop.permute.xlu0 %706 }
  0xe2   : > { %v529_v30 = vadd.f32 %v527_v4, %v504_v13  ;;  %v530_v54 = vadd.f32 %v528_v5, %v505_v14 }
  0xe4   : > { %v677_v6 = vpop.permute.xlu1 %676 }
  0xe5   : > { %v678_v47 = vsel %vm510_vm5, %v675_v0, %v677_v6  ;;  %v679_v48 = vsel %vm510_vm5, %v677_v6, %v675_v0  ;;  %v656_v0 = vadd.f32 %v654_v41, %v640_v49  ;;  %v671_v6 = vmul.f32 %v1246_v29, %v665_v8 }
  0xe6   : > { %v680_v63 = vmul.f32 %v678_v47, %v516_v19  ;;  %v681_v2 = vmul.f32 %v679_v48, %v520_v20 }
  0xe8   : > { %v532_v28 = vpop.permute.xlu1 %531  ;;  %v686_v29 = vmul.f32 %v1268_v55, %v680_v63  ;;  %v687_v20 = vmul.f32 %v1268_v55, %v681_v2  ;;  %v831_v63 = vpop.permute.xlu0 %830 }
  0xec   : > { %v534_v40 = vpop.permute.xlu1 %533 }
  0xed   : > { %v536_v42 = vsel %vm535_vm6, %v532_v28, %v534_v40  ;;  %v537_v44 = vsel %vm535_vm6, %v534_v40, %v532_v28 }
  0xee   : > { %v546_v58 = vmul.f32 %v541_v22, %v536_v42  ;;  %v547_v60 = vmul.f32 %v545_v25, %v537_v44 }
  0xf0   : > { %v693_v61 = vpop.permute.xlu1 %692  ;;  %v552_v52 = vmul.f32 %v1270_v57, %v546_v58  ;;  %v553_v15 = vmul.f32 %v1270_v57, %v547_v60 }
  0xf1   : > { %v694_v3 = vsel %vm535_vm6, %v691_v33, %v693_v61  ;;  %v695_v16 = vsel %vm535_vm6, %v693_v61, %v691_v33 }
  0xf2   : > { %v696_v9 = vmul.f32 %v694_v3, %v541_v22  ;;  %v697_v10 = vmul.f32 %v695_v16, %v545_v25  ;;  %v672_v22 = vadd.f32 %v670_v18, %v656_v0  ;;  %v673_v25 = vadd.f32 %v671_v6, %v657_v17 }
  0xf3   : > { %v555_v35 = vadd.f32 %v553_v15, %v530_v54  ;;  %v554_v37 = vadd.f32 %v552_v52, %v529_v30 }
  0xf4   : > { %v559_v19 = vpop.permute.xlu1 %558  ;;  %v702_v57 = vmul.f32 %v1272_v59, %v696_v9  ;;  %v703_v33 = vmul.f32 %v1272_v59, %v697_v10  ;;  %v688_v38 = vadd.f32 %v686_v29, %v672_v22  ;;  %v689_v27 = vadd.f32 %v687_v20, %v673_v25 }
  0xf5   : > { %v561_v28 = vsel %vm560_vm7, %v557_v62, %v559_v19  ;;  %v562_v23 = vsel %vm560_vm7, %v559_v19, %v557_v62 }
  0xf6   : > { %v571_v32 = vmul.f32 %v966_v11, %v561_v28  ;;  %v572_v53 = vmul.f32 %v967_v12, %v562_v23  ;;  %v705_v59 = vadd.f32 %v703_v33, %v689_v27  ;;  %v704_v44 = vadd.f32 %v702_v57, %v688_v38 }
  0xf8   : > { %v577_v34 = vmul.f32 %v1274_v1, %v571_v32  ;;  %v709_v55 = vpop.permute.xlu1 %708  ;;  %v578_v36 = vmul.f32 %v1274_v1, %v572_v53 }
  0xf9   : > { %v710_v39 = vsel %vm560_vm7, %v707_v21, %v709_v55  ;;  %v711_v26 = vsel %vm560_vm7, %v709_v55, %v707_v21 }
  0xfa   : > { %v712_v40 = vmul.f32 %v966_v11, %v710_v39  ;;  %v713_v41 = vmul.f32 %v967_v12, %v711_v26  ;;  %v580_v43 = vadd.f32 %v578_v36, %v555_v35  ;;  %v579_v42 = vadd.f32 %v577_v34, %v554_v37 }
  0xfc   : > { %v718_v45 = vmul.f32 %v1282_v7, %v712_v40  ;;  %v583_v46 = vpack.c.bf16 %v580_v43, %v580_v43  ;;  %v582_v1 = vpack.c.bf16 %v579_v42, %v579_v42  ;;  %v719_v47 = vmul.f32 %v1282_v7, %v713_v41  ;;  %v722_v7 = vld [vmem:[%s1387_s6] sm:$0xf] }
  0xfe   : > { %970 = vmatprep.subr.msk.bf16.mxu1 %vm729_vm8, %v583_v46  ;;  %v781_v48 = vsel %vm729_vm8, %v582_v1, 0  ;;  %v721_v24 = vadd.f32 %v719_v47, %v705_v59  ;;  %v720_v49 = vadd.f32 %v718_v45, %v704_v44 }
  0xff   : > { %787 = vmatpush1.bf16.msra.mxu1 %v781_v48 }
 0x100   : > { %v724_v51 = vpack.c.bf16 %v721_v24, %v721_v24  ;;  %v723_v8 = vpack.c.bf16 %v720_v49, %v720_v49 }
 0x102   : > { %968 = vmatprep.subr.msk.bf16.mxu0 %vm729_vm8, %v724_v51  ;;  %v731_v31 = vsel %vm729_vm8, %v723_v8, 0  ;;  %971 = vmatmul.mubr.msk.bf16.vlgmr.msra.gmra.mrb[0].mxu1 %vm725_vm9, %v581_v50 }
 0x103   : > { %737 = vmatpush1.bf16.msra.mxu0 %v731_v31 }
 0x106   : > { %969 = vmatmul.mubr.msk.bf16.vlgmr.msra.gmra.mrb[0].mxu0 %vm725_vm9, %v722_v7 }
 0x1d5   : > { %v820_v56 = vpop.f32.mrb[0].mxu1 }
 0x1d6   : > { %v822_v58 = vpop.f32.mrb[1].mxu1 }
 0x1d7   : > { %v824_v60 = vpop.f32.mrb[2].mxu1 }
 0x1d8   : > { %v825_v61 = vpop.f32.mrb[3].mxu1 }
 0x1d9   : > { %v770_v62 = vpop.f32.mrb[0].mxu0 }
 0x1da   : > { %v821_v2 = vadd.f32 %v820_v56, %v770_v62  ;;  %v772_v3 = vpop.f32.mrb[1].mxu0 }
 0x1db   : > { %v823_v16 = vadd.f32 %v822_v58, %v772_v3  ;;  %v774_v0 = vpop.f32.mrb[2].mxu0 }
 0x1dc   : > { %v833_v17 = vadd.f32 %v831_v63, %v821_v2  ;;  %v775_v4 = vpop.f32.mrb[3].mxu0 }
 0x1dd   : > { %v834_v5 = vadd.f32 %v831_v63, %v823_v16 }
 0x1de   : > { %v849_v18 = vmul.f32 %v833_v17, %v833_v17 }
 0x1df   : > { %v978_v6 = vpack.c.bf16 %v834_v5, %v833_v17  ;;  %v844_v9 = vadd.f32 %v834_v5, %v833_v17  ;;  %v850_v10 = vmul.f32 %v834_v5, %v834_v5 }
 0x1e1   : > { %845 = vadd.xlane.f32.xlu1 %v844_v9  ;;  %v851_v11 = vadd.f32 %v850_v10, %v849_v18  ;;  %843 = vst [vmem:[%s359_s28] sm:$0xff] %v978_v6 }
 0x1e3   : > { %852 = vadd.xlane.f32.xlu0 %v851_v11 }
 0x26e   : > { %v846_v12 = vpop.xlane.xlu1 %845 }
 0x26f   : > { %848 = vst.msk [vmem:[%s363_s12] sm:$0xff] %vm847_vm10, %v846_v12 }
 0x270   : > { %v853_v13 = vpop.xlane.xlu0 %852 }
 0x271   : > { %855 = vst.msk [vmem:[%s363_s12] sm:$0xff] %vm854_vm11, %v853_v13 }
 0x272 PF: > { %s20_s30 = sadd.s32 1, %s1026_s30  }
 0x273   : > { %p17_p4 = scmp.ge.s32.totalorder %s20_s30, 4  }
 0x275   :  { %19 = sbr.rel (!%p17_p4) target bundleno = 1 (0x1), region = 97 }

// kernel: up_forward.3
= control target key start
LH: loop header
LB: loop body
LE: loop exit
PB: predicated region body
PF: predicated region fallthrough
CT: control target
= control target key end

     0   :  { %s814_s24 = smov 0   ;;  %s954_s0 = inlined_call_operand.vmem [shape: bf16[2,8,256], index: 0, kind: input, shape index: {}]   ;;  %s955_s1 = inlined_call_operand.vmem [shape: f32[8,2], index: 1, kind: input, shape index: {}]   ;;  %s956_s2 = inlined_call_operand.vmem [shape: f32[8,9], index: 2, kind: input, shape index: {}]   ;;  %s957_s3 = inlined_call_operand.vmem [shape: f32[9,256], index: 3, kind: input, shape index: {}]   ;;  %s958_s4 = inlined_call_operand.vmem [shape: bf16[8,8], index: 4, kind: input, shape index: {}]   ;;  %s959_s5 = inlined_call_operand.vmem [shape: f32[8,1], index: 5, kind: input, shape index: {}]   ;;  %s960_s6 = inlined_call_operand.vmem [shape: bf16[2,8,256], index: 6, kind: output, shape index: {0}]   ;;  %s961_s7 = inlined_call_operand.vmem [shape: f32[2,8,2], index: 7, kind: output, shape index: {1}]  }
   0x1 LB: > { %s692_s25 = sadd.s32 4294967295, %s755_s24   ;;  %p696_p0 = scmp.ge.s32.totalorder %s755_s24, 1  ;;  %s755_s24 = sphi %s814_s24, %s18_s24  }
   0x2   : > { %p240_p1 = scmp.lt.s32.totalorder %s755_s24, 3 }
   0x4   : > { %p241_p2 = pnand %p696_p0, %p240_p1 }
   0x5   : > { %v298_v0 = vld [vmem:[%s955_s1] sm:$0xff] (!%p241_p2)  ;;  %v757_v2 = vmov (!%p241_p2), 0   ;;  %v758_v3 = vmov (!%p241_p2), 4   ;;  %v759_v4 = vmov (!%p241_p2), 1   ;;  %v760_v5 = vmov (!%p241_p2), 2   ;;  %p276_p3 = scmp.lt.s32.totalorder (!%p241_p2), %s692_s25, 1 }
   0x6   : > { %244 = sbr.rel (%p241_p2) target bundleno = 686 (0x2ae), region = 44  ;;  %v314_v1 = vld [vmem:[%s956_s2] sm:$0xff] (!%p241_p2)  ;;  %737 = vset.pattern.permute.xlu0 (!%p241_p2), %v757_v2  ;;  %739 = vset.pattern.permute.xlu1 (!%p241_p2), %v758_v3  ;;  %v761_v6 = vmov (!%p241_p2), 3   ;;  %v762_v7 = vmov (!%p241_p2), 5   ;;  %v763_v8 = vmov (!%p241_p2), 6   ;;  %v764_v9 = vmov (!%p241_p2), 7  }
   0x7   : > { %301 = vperm.xlu0 (!%p241_p2), %737, %v298_v0   ;;  %317 = vperm.xlu1 (!%p241_p2), %739, %v314_v1   ;;  %s765_s11 = smov (!%p241_p2), 17   ;;  %s766_s12 = smov (!%p241_p2), 16   ;;  %v767_v21 = vmov (!%p241_p2), 8   ;;  %v527_v22 = vld [vmem:[%s959_s5] sm:$0xff] (!%p241_p2)  ;;  %v326_v34 = vlaneseq (!%p241_p2)  ;;  %v882_v42 = vld [vmem:[%s957_s3 + $0x8] sm:$0xff] (!%p241_p2)  ;;  %vm537_vm8 = vcmask (!%p241_p2), 1043456  }
   0x8   : > { %576 = vmatprep.mubr.bf16.mxu0 (!%p241_p2), %v757_v2  ;;  %s768_s13 = smov (!%p241_p2), 15   ;;  %s769_s14 = smov (!%p241_p2), 111   ;;  %v877_v41 = vld [vmem:[%s957_s3] sm:$0xff] (!%p241_p2)  ;;  %vm533_vm9 = vcmask (!%p241_p2), 64512   ;;  %vm597_vm10 = vcmask (!%p241_p2), 7168   ;;  %vm604_vm11 = vcmask (!%p241_p2), 15368  }
   0x9   : > { %s770_s15 = smov (!%p241_p2), 1   ;;  %s771_s16 = smov (!%p241_p2), 127   ;;  %v869_v37 = vshrl.u32 (!%p241_p2), %v326_v34, 7  ;;  %v871_v38 = vand.u32 (!%p241_p2), 127, %v326_v34 }
   0xa   : > { %s772_s17 = smov (!%p241_p2), 113   ;;  %s773_s18 = smov (!%p241_p2), 112  }
   0xb   : > { %738 = vset.pattern.permute.xlu0 (!%p241_p2), %v759_v4  ;;  %740 = vset.pattern.permute.xlu1 (!%p241_p2), %v757_v2  ;;  %v333_v40 = vsub.s32 (!%p241_p2), 0, %v869_v37  ;;  %vm328_vm0 = vcmp.lt.s32.totalorder (!%p241_p2), %v871_v38, 17  ;;  %v358_v44 = vsub.s32 (!%p241_p2), 1, %v869_v37  ;;  %vm353_vm1 = vcmp.lt.s32.totalorder (!%p241_p2), %v871_v38, 16 }
   0xc   : > { %307 = vperm.xlu0 (!%p241_p2), %738, %v298_v0   ;;  %342 = vperm.xlu1 (!%p241_p2), %740, %v314_v1   ;;  %v383_v48 = vsub.s32 (!%p241_p2), 2, %v869_v37  ;;  %vm378_vm2 = vcmp.lt.s32.totalorder (!%p241_p2), %v871_v38, 15  ;;  %v408_v56 = vsub.s32 (!%p241_p2), 3, %v869_v37  ;;  %vm403_vm3 = vcmp.lt.s32.totalorder (!%p241_p2), %v871_v38, 1 }
   0xd   : > { %s963_s25 = smov (!%p276_p3, %s692_s25), 1  ;;  %v334_v46 = vrot.slane %v877_v41, %v333_v40  ;;  %v338_v47 = vrot.slane %v882_v42, %v333_v40  ;;  %v359_v51 = vrot.slane %v877_v41, %v358_v44  ;;  %v363_v52 = vrot.slane %v882_v42, %v358_v44 }
   0xe   : > { %s832_s30 = sshll.u32 %s963_s25, 3  ;;  %v384_v60 = vrot.slane %v877_v41, %v383_v48  ;;  %v388_v61 = vrot.slane %v882_v42, %v383_v48  ;;  %v433_v62 = vsub.s32 5, %v869_v37  ;;  %v458_v63 = vsub.s32 6, %v869_v37 }
   0xf   : > { %s280_s10 = scalar_lea.vmem %s954_s0, %s832_s30  ;;  %vm428_vm4 = vcmp.lt.s32.totalorder %v871_v38, 127  ;;  %vm453_vm5 = vcmp.lt.s32.totalorder %v871_v38, 113  ;;  %vm478_vm6 = vcmp.lt.s32.totalorder %v871_v38, 112  ;;  %vm503_vm7 = vcmp.lt.s32.totalorder %v871_v38, 111  ;;  %v524_v38 = vld [vmem:[%s958_s4] sm:$0xf] }
  0x10   : > { %742 = vset.pattern.permute.xlu0 %v760_v5  ;;  %741 = vset.pattern.permute.xlu1 %v759_v4  ;;  %v295_v10 = vld [vmem:[%s280_s10] sm:$0xff] }
  0x11   : > { %392 = vperm.xlu0 %742, %v314_v1   ;;  %367 = vperm.xlu1 %741, %v314_v1   ;;  %v296_v12 = vunpack.c.l.bf16 %v295_v10  ;;  %v297_v13 = vunpack.c.h.bf16 %v295_v10 }
  0x15   : > { %743 = vset.pattern.permute.xlu0 %v761_v6  ;;  %v409_v6 = vrot.slane %v877_v41, %v408_v56 }
  0x16   : > { %417 = vperm.xlu0 %743, %v314_v1  }
  0x1a   : > { %744 = vset.pattern.permute.xlu0 %v762_v7  ;;  %v413_v7 = vrot.slane %v882_v42, %v408_v56 }
  0x1b   : > { %442 = vperm.xlu0 %744, %v314_v1  }
  0x1f   : > { %745 = vset.pattern.permute.xlu0 %v763_v8 }
  0x20   : > { %467 = vperm.xlu0 %745, %v314_v1  }
  0x24   : > { %746 = vset.pattern.permute.xlu0 %v764_v9 }
  0x86   : > { %v302_v11 = vpop.permute.xlu0 %301  ;;  %v318_v23 = vpop.permute.xlu1 %317 }
  0x87   : > { %v304_v14 = vmul.f32 %v302_v11, %v296_v12  ;;  %v305_v15 = vmul.f32 %v302_v11, %v297_v13 }
  0x8b   : > { %v308_v16 = vpop.permute.xlu0 %307  ;;  %v343_v24 = vpop.permute.xlu1 %342 }
  0x8c   : > { %v310_v17 = vadd.f32 %v308_v16, %v304_v14  ;;  %v311_v18 = vadd.f32 %v308_v16, %v305_v15  ;;  %v434_v14 = vrot.slane %v877_v41, %v433_v62  ;;  %v438_v15 = vrot.slane %v882_v42, %v433_v62 }
  0x8e   : > { %v838_v19 = vmax.f32 %v310_v17, 0.0  ;;  %v840_v20 = vmax.f32 %v311_v18, 0.0 }
  0x90   : > { %324 = vrot.lane.b32.xlu1 %v840_v20, %s765_s11  ;;  %322 = vrot.lane.b32.xlu0 %v838_v19, %s765_s11  ;;  %v368_v25 = vpop.permute.xlu1 %367  ;;  %v861_v27 = vpop.permute.xlu0 %392  ;;  %v320_v57 = vmul.f32 %v318_v23, %v838_v19  ;;  %v321_v5 = vmul.f32 %v318_v23, %v840_v20 }
  0x94   : > { %349 = vrot.lane.b32.xlu1 %v838_v19, %s766_s12  ;;  %492 = vperm.xlu0 %746, %v314_v1  }
  0x95   : > { %v863_v30 = vpop.permute.xlu0 %417 }
  0x98   : > { %351 = vrot.lane.b32.xlu1 %v840_v20, %s766_s12  ;;  %747 = vset.pattern.permute.xlu0 %v767_v21  ;;  %s285_s12 = scalar_lea.vmem %s960_s6, %s832_s30 }
  0x99   : > { %517 = vperm.xlu0 %747, %v314_v1  }
  0x9a   : > { %v865_v32 = vpop.permute.xlu0 %442 }
  0x9c   : > { %374 = vrot.lane.b32.xlu1 %v838_v19, %s768_s13 }
  0x9d   : > { %499 = vrot.lane.b32.xlu0 %v838_v19, %s769_s14 }
  0x9e   : > { %748 = vset.pattern.permute.xlu0 %v757_v2 }
  0x9f   : > { %v867_v36 = vpop.permute.xlu0 %467 }
  0xa0   : > { %376 = vrot.lane.b32.xlu1 %v840_v20, %s768_s13 }
  0xa1   : > { %530 = vperm.xlu0 %748, %v527_v22  }
  0xa4   : > { %399 = vrot.lane.b32.xlu1 %v838_v19, %s770_s15 }
  0xa8   : > { %401 = vrot.lane.b32.xlu1 %v840_v20, %s770_s15  ;;  %s289_s15 = scalar_lea.vmem %s961_s7, %s832_s30 }
  0xac   : > { %424 = vrot.lane.b32.xlu1 %v838_v19, %s771_s16 }
  0xb0   : > { %426 = vrot.lane.b32.xlu1 %v840_v20, %s771_s16 }
  0xb4   : > { %449 = vrot.lane.b32.xlu1 %v838_v19, %s772_s17 }
  0xb8   : > { %451 = vrot.lane.b32.xlu1 %v840_v20, %s772_s17 }
  0xbc   : > { %474 = vrot.lane.b32.xlu1 %v838_v19, %s773_s18  ;;  %v459_v19 = vrot.slane %v877_v41, %v458_v63 }
  0xc0   : > { %476 = vrot.lane.b32.xlu1 %v840_v20, %s773_s18 }
  0xc4   : > { %501 = vrot.lane.b32.xlu1 %v840_v20, %s769_s14 }
 0x102   : > { %v325_v26 = vpop.permute.xlu1 %324  ;;  %v323_v43 = vpop.permute.xlu0 %322 }
 0x103   : > { %v329_v49 = vsel %vm328_vm0, %v323_v43, %v325_v26  ;;  %v330_v50 = vsel %vm328_vm0, %v325_v26, %v323_v43 }
 0x104   : > { %v339_v58 = vmul.f32 %v334_v46, %v330_v50  ;;  %v340_v59 = vmul.f32 %v338_v47, %v329_v49 }
 0x106   : > { %v350_v28 = vpop.permute.xlu1 %349  ;;  %v345_v8 = vmul.f32 %v343_v24, %v339_v58  ;;  %v346_v9 = vmul.f32 %v343_v24, %v340_v59 }
 0x108   : > { %v347_v26 = vadd.f32 %v345_v8, %v320_v57 }
 0x10a   : > { %v352_v29 = vpop.permute.xlu1 %351 }
 0x10b   : > { %v354_v54 = vsel %vm353_vm1, %v350_v28, %v352_v29  ;;  %v355_v55 = vsel %vm353_vm1, %v352_v29, %v350_v28  ;;  %v348_v28 = vadd.f32 %v346_v9, %v321_v5  ;;  %v463_v29 = vrot.slane %v882_v42, %v458_v63 }
 0x10c   : > { %v364_v0 = vmul.f32 %v359_v51, %v355_v55  ;;  %v365_v1 = vmul.f32 %v363_v52, %v354_v54 }
 0x10e   : > { %v375_v31 = vpop.permute.xlu1 %374  ;;  %v370_v16 = vmul.f32 %v368_v25, %v364_v0  ;;  %v371_v17 = vmul.f32 %v368_v25, %v365_v1  ;;  %v483_v25 = vsub.s32 7, %v869_v37 }
 0x110   : > { %v372_v44 = vadd.f32 %v370_v16, %v347_v26  ;;  %v373_v46 = vadd.f32 %v371_v17, %v348_v28  ;;  %v484_v50 = vrot.slane %v877_v41, %v483_v25 }
 0x112   : > { %v377_v33 = vpop.permute.xlu1 %376 }
 0x113   : > { %v379_v2 = vsel %vm378_vm2, %v375_v31, %v377_v33  ;;  %v380_v3 = vsel %vm378_vm2, %v377_v33, %v375_v31  ;;  %v493_v18 = vpop.permute.xlu0 %492 }
 0x114   : > { %v389_v12 = vmul.f32 %v384_v60, %v380_v3  ;;  %v390_v13 = vmul.f32 %v388_v61, %v379_v2  ;;  %v703_v61 = vld [vmem:[%s957_s3 + $0x18] ss:$0 sm:$0xff] }
 0x116   : > { %v400_v35 = vpop.permute.xlu1 %399  ;;  %v395_v31 = vmul.f32 %v861_v27, %v389_v12  ;;  %v396_v33 = vmul.f32 %v861_v27, %v390_v13  ;;  %v488_v27 = vrot.slane %v882_v42, %v483_v25 }
 0x118   : > { %v518_v48 = vpop.permute.xlu0 %517  ;;  %v397_v51 = vadd.f32 %v395_v31, %v372_v44  ;;  %v398_v52 = vadd.f32 %v396_v33, %v373_v46 }
 0x11a   : > { %v402_v39 = vpop.permute.xlu1 %401 }
 0x11b   : > { %v404_v10 = vsel %vm403_vm3, %v400_v35, %v402_v39  ;;  %v405_v11 = vsel %vm403_vm3, %v402_v39, %v400_v35 }
 0x11c   : > { %v414_v21 = vmul.f32 %v409_v6, %v405_v11  ;;  %v415_v22 = vmul.f32 %v413_v7, %v404_v10  ;;  %v500_v62 = vpop.permute.xlu0 %499 }
 0x11e   : > { %v425_v45 = vpop.permute.xlu1 %424  ;;  %v421_v47 = vmul.f32 %v863_v30, %v415_v22 }
 0x120   : > { %v423_v57 = vadd.f32 %v421_v47, %v398_v52 }
 0x122   : > { %v427_v53 = vpop.permute.xlu1 %426 }
 0x123   : > { %v429_v23 = vsel %vm428_vm4, %v425_v45, %v427_v53  ;;  %v430_v24 = vsel %vm428_vm4, %v427_v53, %v425_v45  ;;  %v420_v45 = vmul.f32 %v863_v30, %v414_v21 }
 0x124   : > { %v439_v39 = vmul.f32 %v434_v14, %v429_v23  ;;  %v440_v40 = vmul.f32 %v438_v15, %v430_v24 }
 0x125   : > { %v422_v56 = vadd.f32 %v420_v45, %v397_v51 }
 0x126   : > { %v450_v4 = vpop.permute.xlu1 %449  ;;  %v445_v53 = vmul.f32 %v865_v32, %v439_v39  ;;  %v446_v54 = vmul.f32 %v865_v32, %v440_v40  ;;  %v702_v32 = vld [vmem:[%s957_s3 + $0x10] ss:$0 sm:$0xff] }
 0x128   : > { %v447_v63 = vadd.f32 %v445_v53, %v422_v56  ;;  %v448_v0 = vadd.f32 %v446_v54, %v423_v57 }
 0x12a   : > { %v452_v20 = vpop.permute.xlu1 %451 }
 0x12b   : > { %v454_v34 = vsel %vm453_vm5, %v450_v4, %v452_v20  ;;  %v455_v35 = vsel %vm453_vm5, %v452_v20, %v450_v4 }
 0x12c   : > { %v464_v49 = vmul.f32 %v459_v19, %v454_v34  ;;  %v465_v37 = vmul.f32 %v463_v29, %v455_v35 }
 0x12e   : > { %v475_v43 = vpop.permute.xlu1 %474  ;;  %v470_v41 = vmul.f32 %v867_v36, %v464_v49  ;;  %v471_v42 = vmul.f32 %v867_v36, %v465_v37 }
 0x130   : > { %v472_v5 = vadd.f32 %v470_v41, %v447_v63  ;;  %v473_v8 = vadd.f32 %v471_v42, %v448_v0 }
 0x132   : > { %v477_v55 = vpop.permute.xlu1 %476 }
 0x133   : > { %v479_v30 = vsel %vm478_vm6, %v475_v43, %v477_v55  ;;  %v480_v58 = vsel %vm478_vm6, %v477_v55, %v475_v43 }
 0x134   : > { %v489_v59 = vmul.f32 %v484_v50, %v479_v30  ;;  %v490_v60 = vmul.f32 %v488_v27, %v480_v58 }
 0x136   : > { %v495_v1 = vmul.f32 %v493_v18, %v489_v59  ;;  %v496_v2 = vmul.f32 %v493_v18, %v490_v60  ;;  %v502_v3 = vpop.permute.xlu1 %501  ;;  %v531_v18 = vpop.permute.xlu0 %530 }
 0x137   : > { %v504_v4 = vsel %vm503_vm7, %v500_v62, %v502_v3  ;;  %v505_v36 = vsel %vm503_vm7, %v502_v3, %v500_v62 }
 0x138   : > { %v514_v6 = vmul.f32 %v702_v32, %v504_v4  ;;  %v515_v7 = vmul.f32 %v703_v61, %v505_v36  ;;  %v498_v10 = vadd.f32 %v496_v2, %v473_v8  ;;  %v497_v12 = vadd.f32 %v495_v1, %v472_v5 }
 0x13a   : > { %v520_v9 = vmul.f32 %v518_v48, %v514_v6  ;;  %v521_v11 = vmul.f32 %v518_v48, %v515_v7 }
 0x13c   : > { %v523_v13 = vadd.f32 %v521_v11, %v498_v10  ;;  %v522_v14 = vadd.f32 %v520_v9, %v497_v12 }
 0x13e   : > { %v526_v15 = vpack.c.bf16 %v523_v13, %v523_v13  ;;  %v525_v16 = vpack.c.bf16 %v522_v14, %v522_v14 }
 0x140   : > { %704 = vmatprep.subr.msk.bf16.mxu0 %vm537_vm8, %v526_v15  ;;  %v539_v17 = vsel %vm537_vm8, %v525_v16, 0 }
 0x141   : > { %545 = vmatpush1.bf16.msra.mxu0 %v539_v17 }
 0x144   : > { %705 = vmatmul.mubr.msk.bf16.vlgmr.msra.gmra.mrb[0].mxu0 %vm533_vm9, %v524_v38 }
 0x217   : > { %v578_v19 = vpop.f32.mrb[0].mxu0 }
 0x218   : > { %v579_v20 = vadd.f32 %v578_v19, %v531_v18  ;;  %v580_v21 = vpop.f32.mrb[1].mxu0 }
 0x219   : > { %v581_v22 = vadd.f32 %v580_v21, %v531_v18  ;;  %v582_v23 = vpop.f32.mrb[2].mxu0 }
 0x21a   : > { %v583_v24 = vpop.f32.mrb[3].mxu0  ;;  %v599_v26 = vmul.f32 %v579_v20, %v579_v20 }
 0x21b   : > { %v711_v28 = vpack.c.bf16 %v581_v22, %v579_v20  ;;  %v594_v29 = vadd.f32 %v581_v22, %v579_v20  ;;  %v600_v25 = vmul.f32 %v581_v22, %v581_v22 }
 0x21d   : > { %593 = vst [vmem:[%s285_s12] sm:$0xff] %v711_v28  ;;  %595 = vadd.xlane.f32.xlu1 %v594_v29  ;;  %v601_v31 = vadd.f32 %v600_v25, %v599_v26 }
 0x21f   : > { %602 = vadd.xlane.f32.xlu0 %v601_v31 }
 0x2aa   : > { %v596_v33 = vpop.xlane.xlu1 %595 }
 0x2ab   : > { %598 = vst.msk [vmem:[%s289_s15] sm:$0xff] %vm597_vm10, %v596_v33 }
 0x2ac   : > { %v603_v34 = vpop.xlane.xlu0 %602 }
 0x2ad   : > { %605 = vst.msk [vmem:[%s289_s15] sm:$0xff] %vm604_vm11, %v603_v34 }
 0x2ae PF: > { %s18_s24 = sadd.s32 1, %s755_s24  }
 0x2af   : > { %p15_p4 = scmp.ge.s32.totalorder %s18_s24, 4  }
 0x2b1   :  { %17 = sbr.rel (!%p15_p4) target bundleno = 1 (0x1), region = 86 }

</bundles_post_ra>
